<compile_context>
chip_gen: v5e
topology: v5e:2x2
jax: 0.10.0
libtpu: 0.0.40
codegen_flags: <defaults>
</compile_context>

<pallas_src>
import functools
import math

import jax
import jax.numpy as jnp
from jax.experimental import pallas as pl
from jax.experimental.pallas import tpu as pltpu

VMEM = pltpu.MemorySpace.VMEM
LANES = 128


def _ceil8(n):
    return -(-n // 8) * 8


def pack_slab(entries, dtype):
    """Pack named 2-D arrays into a single [rows, 128] slab (8-row aligned entries)."""
    blocks, offsets, row = [], {}, 0
    for name, arr in entries:
        arr = jnp.asarray(arr, dtype)
        nr, nc = arr.shape
        assert nc <= LANES, name
        pr = _ceil8(nr)
        blk = jnp.zeros((pr, LANES), dtype).at[:nr, :nc].set(arr)
        blocks.append(blk)
        offsets[name] = (row, nr, nc)          # static python ints
        row += pr
    return jnp.concatenate(blocks, axis=0), offsets


# --------------------------------------------------------------------------
# Fused forward kernel (single grid point; everything VMEM resident)
# --------------------------------------------------------------------------
def _fused_forward_kernel(x_ref, w_ref, v_ref, out_ref, *,
                          w_off, v_off, num_layers, num_relations, num_heads,
                          n_nodes, hidden, batch, eps, neg_slope):
    H, R, N, B = hidden, num_relations, n_nodes, batch

    def wp(name):                                      # bf16 weight slab entry
        r0, nr, nc = w_off[name]
        return w_ref[r0:r0 + nr, :nc]

    def vp(name):                                      # f32 vector/mask slab entry
        r0, nr, nc = v_off[name]
        return v_ref[r0:r0 + nr, :nc]

    def mxu(a, b):
        # bf16 MXU inputs, f32 accumulation.
        return jnp.dot(a.astype(jnp.bfloat16), b.astype(jnp.bfloat16),
                       preferred_element_type=jnp.float32)

    def layernorm(y, g, b):
        mu = jnp.mean(y, axis=-1, keepdims=True)
        var = jnp.mean(jnp.square(y - mu), axis=-1, keepdims=True)
        return (y - mu) * jax.lax.rsqrt(var + eps) * g + b

    def gelu(v):
        # tanh-approximate GELU (EUP); torch default is exact erf (~1e-3 diff).
        return jax.nn.gelu(v, approximate=True)

    # ---- 1) input_projection: Linear -> LayerNorm -> GELU -> Dropout(no-op) ----
    h = gelu(layernorm(mxu(x_ref[...], wp("in_w")) + vp("in_b"),
                       vp("in_g"), vp("in_beta")))                        # [N, H]

    # ---- 2) relation-aware graph layers: 2 matmuls / layer ----
    #   out = sum_r A_r @ (h @ W_r) + b
    a_hcat = wp("a_hcat")                                                 # [N, R*N]
    for l in range(num_layers):
        u = mxu(h, wp(f"rel_w{l}"))                                       # [N, R*H]
        u_vs = jnp.concatenate(
            [u[:, r * H:(r + 1) * H] for r in range(R)], axis=0)          # [R*N, H]
        h = gelu(mxu(a_hcat, u_vs) + vp(f"rel_b{l}"))                     # [N, H]

    # ---- 3) dense multi-head GATConv, vectorized over heads ----
    xp = mxu(h, wp("gat_w"))                                              # [N, H]
    att = mxu(xp, wp("att_blk"))                                          # [N, 2*heads]
    a_src = att[:, :num_heads]                                            # [N, heads]
    a_dst = att[:, num_heads:2 * num_heads]                               # [N, heads]
    a_srcT = jnp.transpose(a_src)                                         # [heads, N] (XLU)
    # e_all[hh*N + i, j] = a_dst[i, hh] + a_src[j, hh]
    e_all = jnp.concatenate(
        [a_dst[:, hh:hh + 1] + a_srcT[hh:hh + 1, :] for hh in range(num_heads)],
        axis=0)                                                           # [heads*N, N]
    e_all = jnp.where(e_all >= 0.0, e_all, neg_slope * e_all)             # leaky_relu(0.2)
    e_all = jnp.where(vp("mask_all") > 0.0, e_all, -1e30)                 # mask non-edges
    e_all = e_all - jnp.max(e_all, axis=-1, keepdims=True)
    p = jnp.exp(e_all)                                                    # masked -> 0
    alpha = p * pl.reciprocal(jnp.sum(p, axis=-1, keepdims=True), approx=True)
    agg = mxu(alpha, xp)                                                  # [heads*N, H]
    hmask = vp("hmask")                                                   # [heads, H]
    parts = [agg[hh * N:(hh + 1) * N, :] * hmask[hh:hh + 1, :]
             for hh in range(num_heads)]                                  # VPU-only sum
    acc = parts[0]
    for piece in parts[1:]:
        acc = acc + piece
    graph_h = acc + vp("gat_b")                                           # [N, H]

    # ---- 4) pooling (one matmul): rows 0:B graph-mean, rows B:2B per-seq mean ----
    pooled = mxu(wp("pool_both"), graph_h)                                # [2B, H]
    combined = jnp.concatenate([pooled[:B, :], pooled[B:2 * B, :]], axis=-1)  # [B, 2H]

    # ---- 5) feature_fusion: Linear(concat) -> LayerNorm -> GELU ----
    fused = gelu(layernorm(mxu(combined, wp("fus_w")) + vp("fus_b"),
                           vp("fus_g"), vp("fus_beta")))                  # [B, H]

    # ---- 6) fused category + tax heads: two lane-dense matmuls, one store ----
    y1 = mxu(fused, wp("heads_w1")) + vp("heads_b1")                      # [B, 4H]
    yc = gelu(layernorm(y1[:, :2 * H], vp("o1_g"), vp("o1_beta")))        # category hidden
    yt = gelu(layernorm(y1[:, 2 * H:4 * H], vp("t1_g"), vp("t1_beta")))   # tax hidden
    ycat = jnp.concatenate([yc, yt], axis=-1)                             # [B, 4H]
    out_ref[...] = mxu(ycat, wp("heads_w2")) + vp("heads_b2")             # [B, 128]


# --------------------------------------------------------------------------
# Parameter init (deterministic, synthetic); MXU-facing weights bf16-rounded
# --------------------------------------------------------------------------
def init_raw_params(key, input_dim, hidden, output_dim, tax_dim,
                    num_relations, num_graph_layers, num_heads):
    keys = iter(jax.random.split(key, 16))

    def dense(shape, fan_in):
        w = jax.random.normal(next(keys), shape, jnp.float32) / math.sqrt(fan_in)
        return w.astype(jnp.bfloat16).astype(jnp.float32)     # bf16-representable

    def ln_pair(h):
        return jnp.ones((1, h), jnp.float32), jnp.zeros((1, h), jnp.float32)

    dh = hidden // num_heads
    p = {}
    p["in_w"] = dense((input_dim, hidden), input_dim)
    p["in_b"] = jnp.zeros((1, hidden), jnp.float32)
    p["in_g"], p["in_beta"] = ln_pair(hidden)
    p["rel_w"] = dense((num_graph_layers, num_relations, hidden, hidden), hidden)
    p["rel_b"] = jnp.zeros((num_graph_layers, 1, hidden), jnp.float32)
    p["gat_w"] = dense((hidden, hidden), hidden)
    att_src = dense((num_heads, dh), dh)
    att_dst = dense((num_heads, dh), dh)
    eye_h = jnp.eye(num_heads, dtype=jnp.float32)
    p["asrc_blk"] = jnp.einsum("hd,hk->hdk", att_src, eye_h).reshape(hidden, num_heads)
    p["adst_blk"] = jnp.einsum("hd,hk->hdk", att_dst, eye_h).reshape(hidden, num_heads)
    p["gat_b"] = jnp.zeros((1, hidden), jnp.float32)
    p["fus_w"] = dense((2 * hidden, hidden), 2 * hidden)
    p["fus_b"] = jnp.zeros((1, hidden), jnp.float32)
    p["fus_g"], p["fus_beta"] = ln_pair(hidden)
    p["o1_w"] = dense((hidden, 2 * hidden), hidden)
    p["o1_b"] = jnp.zeros((1, 2 * hidden), jnp.float32)
    p["o1_g"], p["o1_beta"] = ln_pair(2 * hidden)
    p["o2_w"] = dense((2 * hidden, output_dim), 2 * hidden)
    p["o2_b"] = jnp.zeros((1, output_dim), jnp.float32)
    p["t1_w"] = dense((hidden, 2 * hidden), hidden)
    p["t1_b"] = jnp.zeros((1, 2 * hidden), jnp.float32)
    p["t1_g"], p["t1_beta"] = ln_pair(2 * hidden)
    p["t2_w"] = dense((2 * hidden, tax_dim), 2 * hidden)
    p["t2_b"] = jnp.zeros((1, tax_dim), jnp.float32)
    return p


# --------------------------------------------------------------------------
# Host-side graph preprocessing (dense adjacency / masks / pooling operators)
# --------------------------------------------------------------------------
def preprocess_graph(src, dst, edge_type, edge_attr, num_nodes, num_relations,
                     num_heads, hidden, batch_size, seq_len):
    N = num_nodes
    # per-relation dense adjacency: A_r[i, j] = sum edge_attr over edges (j -> i, type r)
    rel_adj = jnp.zeros((num_relations, N, N), jnp.float32)
    rel_adj = rel_adj.at[edge_type, dst, src].add(edge_attr[:, 0])
    rel_adj = rel_adj.astype(jnp.bfloat16).astype(jnp.float32)   # bf16-representable
    a_hcat = jnp.concatenate([rel_adj[r] for r in range(num_relations)], axis=1)

    # dense GAT mask with self-loops (duplicate parallel edges collapse to one slot)
    gat_mask = jnp.zeros((N, N), jnp.float32).at[dst, src].set(1.0)
    gat_mask = jnp.maximum(gat_mask, jnp.eye(N, dtype=jnp.float32))
    mask_all = jnp.tile(gat_mask, (num_heads, 1))                 # [heads*N, N]

    dh = hidden // num_heads
    hmask = jnp.repeat(jnp.eye(num_heads, dtype=jnp.float32), dh, axis=1)  # [heads, H]

    pool_graph = jnp.full((batch_size, N), 1.0 / N, jnp.float32)
    pool_seq = jnp.repeat(jnp.eye(batch_size, dtype=jnp.float32), seq_len, axis=1) / seq_len
    pool_both = jnp.concatenate([pool_graph, pool_seq], axis=0)   # [2B, N]
    return dict(rel_adj=rel_adj, a_hcat=a_hcat, gat_mask=gat_mask,
                mask_all=mask_all, hmask=hmask, pool_both=pool_both)


# --------------------------------------------------------------------------
# Pack all parameters / graph operators into two slabs (few DMAs, lane-dense)
# --------------------------------------------------------------------------
def build_slabs(p, g, num_graph_layers, num_relations, hidden, output_dim, tax_dim):
    H, R = hidden, num_relations
    assert 4 * H <= LANES and R * H <= LANES, "slab packing sized for hidden<=32, R*H<=128"

    w_entries = [("in_w", p["in_w"])]
    for l in range(num_graph_layers):
        w_hcat = jnp.concatenate([p["rel_w"][l, r] for r in range(R)], axis=1)  # [H, R*H]
        w_entries.append((f"rel_w{l}", w_hcat))
    w_entries += [
        ("gat_w", p["gat_w"]),
        ("att_blk", jnp.concatenate([p["asrc_blk"], p["adst_blk"]], axis=1)),   # [H, 2*heads]
        ("a_hcat", g["a_hcat"]),
        ("pool_both", g["pool_both"]),
        ("fus_w", p["fus_w"]),
        ("heads_w1", jnp.concatenate([p["o1_w"], p["t1_w"]], axis=1)),          # [H, 4H]
    ]
    heads_w2 = jnp.zeros((4 * H, LANES), jnp.float32)
    heads_w2 = heads_w2.at[:2 * H, :output_dim].set(p["o2_w"])
    heads_w2 = heads_w2.at[2 * H:, output_dim:output_dim + tax_dim].set(p["t2_w"])
    w_entries.append(("heads_w2", heads_w2))
    w_slab, w_off = pack_slab(w_entries, jnp.bfloat16)

    heads_b1 = jnp.concatenate([p["o1_b"], p["t1_b"]], axis=1)                  # [1, 4H]
    heads_b2 = jnp.zeros((1, LANES), jnp.float32)
    heads_b2 = heads_b2.at[:, :output_dim].set(p["o2_b"])
    heads_b2 = heads_b2.at[:, output_dim:output_dim + tax_dim].set(p["t2_b"])
    v_entries = [("in_b", p["in_b"]), ("in_g", p["in_g"]), ("in_beta", p["in_beta"])]
    for l in range(num_graph_layers):
        v_entries.append((f"rel_b{l}", p["rel_b"][l]))
    v_entries += [
        ("gat_b", p["gat_b"]),
        ("mask_all", g["mask_all"]),
        ("hmask", g["hmask"]),
        ("fus_b", p["fus_b"]), ("fus_g", p["fus_g"]), ("fus_beta", p["fus_beta"]),
        ("heads_b1", heads_b1),
        ("o1_g", p["o1_g"]), ("o1_beta", p["o1_beta"]),
        ("t1_g", p["t1_g"]), ("t1_beta", p["t1_beta"]),
        ("heads_b2", heads_b2),
    ]
    v_slab, v_off = pack_slab(v_entries, jnp.float32)
    return w_slab, w_off, v_slab, v_off


# --------------------------------------------------------------------------
# Forward wrapper: single pallas_call, eval mode, multi_task=True,
# seq_features=None, company_features=None
# --------------------------------------------------------------------------
def make_forward(w_off, v_off, *, num_graph_layers, num_relations, num_heads,
                 n_nodes, hidden, batch, output_dim, tax_dim,
                 eps=1e-5, neg_slope=0.2):
    kernel = functools.partial(
        _fused_forward_kernel, w_off=w_off, v_off=v_off,
        num_layers=num_graph_layers, num_relations=num_relations,
        num_heads=num_heads, n_nodes=n_nodes, hidden=hidden, batch=batch,
        eps=eps, neg_slope=neg_slope)

    @jax.jit
    def fwd(x, w_slab, v_slab):
        out = pl.pallas_call(
            kernel,
            out_shape=jax.ShapeDtypeStruct((batch, LANES), jnp.float32),
            in_specs=[pl.BlockSpec(memory_space=VMEM)] * 3,
            out_specs=pl.BlockSpec(memory_space=VMEM),
        )(x, w_slab, v_slab)
        return out[:, :output_dim], out[:, output_dim:output_dim + tax_dim]

    return fwd


# --------------------------------------------------------------------------
# Pure-JAX reference (same bf16 input rounding) for correctness checking
# --------------------------------------------------------------------------
def reference_forward(p, g, x, *, num_graph_layers, num_relations, num_heads,
                      hidden, batch, eps=1e-5):
    bf = jnp.bfloat16

    def rmm(a, b):
        return jnp.dot(a.astype(bf).astype(jnp.float32),
                       b.astype(bf).astype(jnp.float32))

    def ln(y, gamma, beta):
        mu = y.mean(-1, keepdims=True)
        var = jnp.square(y - mu).mean(-1, keepdims=True)
        return (y - mu) * jax.lax.rsqrt(var + eps) * gamma + beta

    gelu = lambda v: jax.nn.gelu(v, approximate=True)
    dh = hidden // num_heads

    h = gelu(ln(rmm(x, p["in_w"]) + p["in_b"], p["in_g"], p["in_beta"]))
    for l in range(num_graph_layers):
        s = jnp.zeros_like(h)
        for r in range(num_relations):
            s = s + rmm(g["rel_adj"][r], rmm(h, p["rel_w"][l, r]))
        h = gelu(s + p["rel_b"][l])
    xp = rmm(h, p["gat_w"])
    a_src = rmm(xp, p["asrc_blk"])
    a_dst = rmm(xp, p["adst_blk"])
    heads_out = []
    for hh in range(num_heads):
        e = a_dst[:, hh:hh + 1] + a_src[:, hh][None, :]
        e = jnp.where(e >= 0, e, 0.2 * e)
        e = jnp.where(g["gat_mask"] > 0, e, -1e30)
        e = e - e.max(-1, keepdims=True)
        pe = jnp.exp(e)
        alpha = pe / pe.sum(-1, keepdims=True)
        heads_out.append(rmm(alpha, xp)[:, hh * dh:(hh + 1) * dh])
    graph_h = jnp.concatenate(heads_out, axis=-1) + p["gat_b"]
    pooled = rmm(g["pool_both"], graph_h)
    combined = jnp.concatenate([pooled[:batch], pooled[batch:]], axis=-1)
    fused = gelu(ln(rmm(combined, p["fus_w"]) + p["fus_b"], p["fus_g"], p["fus_beta"]))
    ch = gelu(ln(rmm(fused, p["o1_w"]) + p["o1_b"], p["o1_g"], p["o1_beta"]))
    cat = rmm(ch, p["o2_w"]) + p["o2_b"]
    th = gelu(ln(rmm(fused, p["t1_w"]) + p["t1_b"], p["t1_g"], p["t1_beta"]))
    tax = rmm(th, p["t2_w"]) + p["t2_b"]
    return cat, tax


# --------------------------------------------------------------------------
if __name__ == "__main__":
    INPUT_DIM = 16
    HIDDEN = 32
    OUTPUT_DIM = 16
    TAX_DIM = 8
    NUM_RELATIONS = 4
    NUM_GRAPH_LAYERS = 2
    NUM_HEADS = 4
    BATCH, SEQ = 2, 8
    N = BATCH * SEQ          # num_nodes
    E = 40                   # num_edges

    key = jax.random.PRNGKey(0)
    kp, kx, ks, kd, kt, ka = jax.random.split(key, 6)

    params = init_raw_params(kp, INPUT_DIM, HIDDEN, OUTPUT_DIM, TAX_DIM,
                             NUM_RELATIONS, NUM_GRAPH_LAYERS, NUM_HEADS)

    # node features + synthetic graph (edge_index[0]=src, edge_index[1]=dst)
    x = jax.random.normal(kx, (N, INPUT_DIM), jnp.float32)
    src = jax.random.randint(ks, (E,), 0, N)
    dst = jax.random.randint(kd, (E,), 0, N)
    edge_type = jax.random.randint(kt, (E,), 0, NUM_RELATIONS)
    edge_attr = jax.random.uniform(ka, (E, 1), minval=0.5, maxval=1.5, dtype=jnp.float32)

    graph = preprocess_graph(src, dst, edge_type, edge_attr, N, NUM_RELATIONS,
                             NUM_HEADS, HIDDEN, BATCH, SEQ)

    w_slab, w_off, v_slab, v_off = build_slabs(params, graph, NUM_GRAPH_LAYERS,
                                               NUM_RELATIONS, HIDDEN,
                                               OUTPUT_DIM, TAX_DIM)

    # TODO(synk): HyperTemporalTransactionModel is not defined in the provided
    # source; the module's documented fallback (temporal_h = temp_input.mean(dim=1))
    # is implemented via the pool_both matmul inside the fused kernel.
    fwd = make_forward(w_off, v_off, num_graph_layers=NUM_GRAPH_LAYERS,
                       num_relations=NUM_RELATIONS, num_heads=NUM_HEADS,
                       n_nodes=N, hidden=HIDDEN, batch=BATCH,
                       output_dim=OUTPUT_DIM, tax_dim=TAX_DIM)

    category_logits, tax_logits = fwd(x, w_slab, v_slab)
    jax.block_until_ready((category_logits, tax_logits))

    cat_ref, tax_ref = reference_forward(
        params, graph, x, num_graph_layers=NUM_GRAPH_LAYERS,
        num_relations=NUM_RELATIONS, num_heads=NUM_HEADS,
        hidden=HIDDEN, batch=BATCH)

    assert category_logits.shape == (BATCH, OUTPUT_DIM)
    assert tax_logits.shape == (BATCH, TAX_DIM)
    assert bool(jnp.all(jnp.isfinite(category_logits)))
    assert bool(jnp.all(jnp.isfinite(tax_logits)))
    assert bool(jnp.allclose(category_logits, cat_ref, atol=3e-2, rtol=3e-2)), \
        float(jnp.max(jnp.abs(category_logits - cat_ref)))
    assert bool(jnp.allclose(tax_logits, tax_ref, atol=3e-2, rtol=3e-2)), \
        float(jnp.max(jnp.abs(tax_logits - tax_ref)))
    print("KERNEL_OK")
</pallas_src>

<mosaic_0001>
module attributes {stable_mosaic.version = 11 : i64} {
  func.func @_fused_forward_kernel(%arg0: memref<16x16xf32, #tpu.memory_space<vmem>>, %arg1: memref<392x128xbf16, #tpu.memory_space<vmem>>, %arg2: memref<192x128xf32, #tpu.memory_space<vmem>>, %arg3: memref<2x128xf32, #tpu.memory_space<vmem>>) attributes {dimension_semantics = [], scalar_prefetch = 0 : i64, scratch_operands = 0 : i64, tpu.core_type = #tpu.core_type<tc>} {
    %c0 = arith.constant 0 : index
    %c0_0 = arith.constant 0 : index
    %0 = vector.load %arg0[%c0, %c0_0] : memref<16x16xf32, #tpu.memory_space<vmem>>, vector<16x16xf32>
    %c0_1 = arith.constant 0 : index
    %c0_2 = arith.constant 0 : index
    %1 = vector.load %arg1[%c0_1, %c0_2] : memref<392x128xbf16, #tpu.memory_space<vmem>>, vector<16x32xbf16>
    %2 = arith.truncf %0 : vector<16x16xf32> to vector<16x16xbf16>
    %cst = arith.constant dense<0.000000e+00> : vector<16x32xf32>
    %3 = tpu.matmul %2, %1, %cst {dimension_numbers = #tpu.dot_dimension_numbers<[1], [0], [0], [1], [0, 0, 1, 1], [], []>} : vector<16x16xbf16>, vector<16x32xbf16>, vector<16x32xf32> -> vector<16x32xf32>
    %c0_3 = arith.constant 0 : index
    %c0_4 = arith.constant 0 : index
    %4 = vector.load %arg2[%c0_3, %c0_4] : memref<192x128xf32, #tpu.memory_space<vmem>>, vector<1x32xf32>
    %5 = vector.broadcast %4 : vector<1x32xf32> to vector<16x32xf32>
    %6 = arith.addf %3, %5 : vector<16x32xf32>
    %c8 = arith.constant 8 : index
    %c0_5 = arith.constant 0 : index
    %7 = vector.load %arg2[%c8, %c0_5] : memref<192x128xf32, #tpu.memory_space<vmem>>, vector<1x32xf32>
    %c16 = arith.constant 16 : index
    %c0_6 = arith.constant 0 : index
    %8 = vector.load %arg2[%c16, %c0_6] : memref<192x128xf32, #tpu.memory_space<vmem>>, vector<1x32xf32>
    %cst_7 = arith.constant dense<0.000000e+00> : vector<16xf32>
    %9 = vector.multi_reduction <add>, %6, %cst_7 [1] : vector<16x32xf32> to vector<16xf32>
    %10 = vector.shape_cast %9 : vector<16xf32> to vector<16x1xf32>
    %cst_8 = arith.constant 3.200000e+01 : f32
    %11 = vector.broadcast %cst_8 : f32 to vector<16x1xf32>
    %12 = arith.divf %10, %11 : vector<16x1xf32>
    %13 = vector.broadcast %12 : vector<16x1xf32> to vector<16x32xf32>
    %14 = arith.subf %6, %13 : vector<16x32xf32>
    %15 = arith.mulf %14, %14 : vector<16x32xf32>
    %cst_9 = arith.constant dense<0.000000e+00> : vector<16xf32>
    %16 = vector.multi_reduction <add>, %15, %cst_9 [1] : vector<16x32xf32> to vector<16xf32>
    %17 = vector.shape_cast %16 : vector<16xf32> to vector<16x1xf32>
    %cst_10 = arith.constant 3.200000e+01 : f32
    %18 = vector.broadcast %cst_10 : f32 to vector<16x1xf32>
    %19 = arith.divf %17, %18 : vector<16x1xf32>
    %20 = vector.broadcast %12 : vector<16x1xf32> to vector<16x32xf32>
    %21 = arith.subf %6, %20 : vector<16x32xf32>
    %cst_11 = arith.constant 9.99999974E-6 : f32
    %22 = vector.broadcast %cst_11 : f32 to vector<16x1xf32>
    %23 = arith.addf %19, %22 : vector<16x1xf32>
    %24 = math.rsqrt %23 : vector<16x1xf32>
    %25 = vector.broadcast %24 : vector<16x1xf32> to vector<16x32xf32>
    %26 = arith.mulf %21, %25 : vector<16x32xf32>
    %27 = vector.broadcast %7 : vector<1x32xf32> to vector<16x32xf32>
    %28 = arith.mulf %26, %27 : vector<16x32xf32>
    %29 = vector.broadcast %8 : vector<1x32xf32> to vector<16x32xf32>
    %30 = arith.addf %28, %29 : vector<16x32xf32>
    %31 = arith.mulf %30, %30 : vector<16x32xf32>
    %32 = arith.mulf %30, %31 : vector<16x32xf32>
    %cst_12 = arith.constant 4.471500e-02 : f32
    %33 = vector.broadcast %cst_12 : f32 to vector<16x32xf32>
    %34 = arith.mulf %33, %32 : vector<16x32xf32>
    %35 = arith.addf %30, %34 : vector<16x32xf32>
    %cst_13 = arith.constant 0.797884583 : f32
    %36 = vector.broadcast %cst_13 : f32 to vector<16x32xf32>
    %37 = arith.mulf %36, %35 : vector<16x32xf32>
    %38 = math.tanh %37 : vector<16x32xf32>
    %cst_14 = arith.constant 1.000000e+00 : f32
    %39 = vector.broadcast %cst_14 : f32 to vector<16x32xf32>
    %40 = arith.addf %39, %38 : vector<16x32xf32>
    %cst_15 = arith.constant 5.000000e-01 : f32
    %41 = vector.broadcast %cst_15 : f32 to vector<16x32xf32>
    %42 = arith.mulf %41, %40 : vector<16x32xf32>
    %43 = arith.mulf %30, %42 : vector<16x32xf32>
    %c144 = arith.constant 144 : index
    %c0_16 = arith.constant 0 : index
    %44 = vector.load %arg1[%c144, %c0_16] : memref<392x128xbf16, #tpu.memory_space<vmem>>, vector<16x64xbf16>
    %c16_17 = arith.constant 16 : index
    %c0_18 = arith.constant 0 : index
    %45 = vector.load %arg1[%c16_17, %c0_18] : memref<392x128xbf16, #tpu.memory_space<vmem>>, vector<32x128xbf16>
    %46 = arith.truncf %43 : vector<16x32xf32> to vector<16x32xbf16>
    %cst_19 = arith.constant dense<0.000000e+00> : vector<16x128xf32>
    %47 = tpu.matmul %46, %45, %cst_19 {dimension_numbers = #tpu.dot_dimension_numbers<[1], [0], [0], [1], [0, 0, 1, 1], [], []>} : vector<16x32xbf16>, vector<32x128xbf16>, vector<16x128xf32> -> vector<16x128xf32>
    %48 = vector.extract_strided_slice %47 {offsets = [0, 0], sizes = [16, 32], strides = [1, 1]} : vector<16x128xf32> to vector<16x32xf32>
    %49 = vector.extract_strided_slice %47 {offsets = [0, 32], sizes = [16, 32], strides = [1, 1]} : vector<16x128xf32> to vector<16x32xf32>
    %50 = vector.extract_strided_slice %47 {offsets = [0, 64], sizes = [16, 32], strides = [1, 1]} : vector<16x128xf32> to vector<16x32xf32>
    %51 = vector.extract_strided_slice %47 {offsets = [0, 96], sizes = [16, 32], strides = [1, 1]} : vector<16x128xf32> to vector<16x32xf32>
    %52 = tpu.concatenate %48, %49, %50, %51 in 0 : vector<16x32xf32>, vector<16x32xf32>, vector<16x32xf32>, vector<16x32xf32> -> vector<64x32xf32>
    %53 = arith.truncf %52 : vector<64x32xf32> to vector<64x32xbf16>
    %cst_20 = arith.constant dense<0.000000e+00> : vector<16x32xf32>
    %54 = tpu.matmul %44, %53, %cst_20 {dimension_numbers = #tpu.dot_dimension_numbers<[1], [0], [0], [1], [0, 0, 1, 1], [], []>} : vector<16x64xbf16>, vector<64x32xbf16>, vector<16x32xf32> -> vector<16x32xf32>
    %c24 = arith.constant 24 : index
    %c0_21 = arith.constant 0 : index
    %55 = vector.load %arg2[%c24, %c0_21] : memref<192x128xf32, #tpu.memory_space<vmem>>, vector<1x32xf32>
    %56 = vector.broadcast %55 : vector<1x32xf32> to vector<16x32xf32>
    %57 = arith.addf %54, %56 : vector<16x32xf32>
    %58 = arith.mulf %57, %57 : vector<16x32xf32>
    %59 = arith.mulf %57, %58 : vector<16x32xf32>
    %cst_22 = arith.constant 4.471500e-02 : f32
    %60 = vector.broadcast %cst_22 : f32 to vector<16x32xf32>
    %61 = arith.mulf %60, %59 : vector<16x32xf32>
    %62 = arith.addf %57, %61 : vector<16x32xf32>
    %cst_23 = arith.constant 0.797884583 : f32
    %63 = vector.broadcast %cst_23 : f32 to vector<16x32xf32>
    %64 = arith.mulf %63, %62 : vector<16x32xf32>
    %65 = math.tanh %64 : vector<16x32xf32>
    %cst_24 = arith.constant 1.000000e+00 : f32
    %66 = vector.broadcast %cst_24 : f32 to vector<16x32xf32>
    %67 = arith.addf %66, %65 : vector<16x32xf32>
    %cst_25 = arith.constant 5.000000e-01 : f32
    %68 = vector.broadcast %cst_25 : f32 to vector<16x32xf32>
    %69 = arith.mulf %68, %67 : vector<16x32xf32>
    %70 = arith.mulf %57, %69 : vector<16x32xf32>
    %c48 = arith.constant 48 : index
    %c0_26 = arith.constant 0 : index
    %71 = vector.load %arg1[%c48, %c0_26] : memref<392x128xbf16, #tpu.memory_space<vmem>>, vector<32x128xbf16>
    %72 = arith.truncf %70 : vector<16x32xf32> to vector<16x32xbf16>
    %cst_27 = arith.constant dense<0.000000e+00> : vector<16x128xf32>
    %73 = tpu.matmul %72, %71, %cst_27 {dimension_numbers = #tpu.dot_dimension_numbers<[1], [0], [0], [1], [0, 0, 1, 1], [], []>} : vector<16x32xbf16>, vector<32x128xbf16>, vector<16x128xf32> -> vector<16x128xf32>
    %74 = vector.extract_strided_slice %73 {offsets = [0, 0], sizes = [16, 32], strides = [1, 1]} : vector<16x128xf32> to vector<16x32xf32>
    %75 = vector.extract_strided_slice %73 {offsets = [0, 32], sizes = [16, 32], strides = [1, 1]} : vector<16x128xf32> to vector<16x32xf32>
    %76 = vector.extract_strided_slice %73 {offsets = [0, 64], sizes = [16, 32], strides = [1, 1]} : vector<16x128xf32> to vector<16x32xf32>
    %77 = vector.extract_strided_slice %73 {offsets = [0, 96], sizes = [16, 32], strides = [1, 1]} : vector<16x128xf32> to vector<16x32xf32>
    %78 = tpu.concatenate %74, %75, %76, %77 in 0 : vector<16x32xf32>, vector<16x32xf32>, vector<16x32xf32>, vector<16x32xf32> -> vector<64x32xf32>
    %79 = arith.truncf %78 : vector<64x32xf32> to vector<64x32xbf16>
    %cst_28 = arith.constant dense<0.000000e+00> : vector<16x32xf32>
    %80 = tpu.matmul %44, %79, %cst_28 {dimension_numbers = #tpu.dot_dimension_numbers<[1], [0], [0], [1], [0, 0, 1, 1], [], []>} : vector<16x64xbf16>, vector<64x32xbf16>, vector<16x32xf32> -> vector<16x32xf32>
    %c32 = arith.constant 32 : index
    %c0_29 = arith.constant 0 : index
    %81 = vector.load %arg2[%c32, %c0_29] : memref<192x128xf32, #tpu.memory_space<vmem>>, vector<1x32xf32>
    %82 = vector.broadcast %81 : vector<1x32xf32> to vector<16x32xf32>
    %83 = arith.addf %80, %82 : vector<16x32xf32>
    %84 = arith.mulf %83, %83 : vector<16x32xf32>
    %85 = arith.mulf %83, %84 : vector<16x32xf32>
    %cst_30 = arith.constant 4.471500e-02 : f32
    %86 = vector.broadcast %cst_30 : f32 to vector<16x32xf32>
    %87 = arith.mulf %86, %85 : vector<16x32xf32>
    %88 = arith.addf %83, %87 : vector<16x32xf32>
    %cst_31 = arith.constant 0.797884583 : f32
    %89 = vector.broadcast %cst_31 : f32 to vector<16x32xf32>
    %90 = arith.mulf %89, %88 : vector<16x32xf32>
    %91 = math.tanh %90 : vector<16x32xf32>
    %cst_32 = arith.constant 1.000000e+00 : f32
    %92 = vector.broadcast %cst_32 : f32 to vector<16x32xf32>
    %93 = arith.addf %92, %91 : vector<16x32xf32>
    %cst_33 = arith.constant 5.000000e-01 : f32
    %94 = vector.broadcast %cst_33 : f32 to vector<16x32xf32>
    %95 = arith.mulf %94, %93 : vector<16x32xf32>
    %96 = arith.mulf %83, %95 : vector<16x32xf32>
    %c80 = arith.constant 80 : index
    %c0_34 = arith.constant 0 : index
    %97 = vector.load %arg1[%c80, %c0_34] : memref<392x128xbf16, #tpu.memory_space<vmem>>, vector<32x32xbf16>
    %98 = arith.truncf %96 : vector<16x32xf32> to vector<16x32xbf16>
    %cst_35 = arith.constant dense<0.000000e+00> : vector<16x32xf32>
    %99 = tpu.matmul %98, %97, %cst_35 {dimension_numbers = #tpu.dot_dimension_numbers<[1], [0], [0], [1], [0, 0, 1, 1], [], []>} : vector<16x32xbf16>, vector<32x32xbf16>, vector<16x32xf32> -> vector<16x32xf32>
    %c112 = arith.constant 112 : index
    %c0_36 = arith.constant 0 : index
    %100 = vector.load %arg1[%c112, %c0_36] : memref<392x128xbf16, #tpu.memory_space<vmem>>, vector<32x8xbf16>
    %101 = arith.truncf %99 : vector<16x32xf32> to vector<16x32xbf16>
    %cst_37 = arith.constant dense<0.000000e+00> : vector<16x8xf32>
    %102 = tpu.matmul %101, %100, %cst_37 {dimension_numbers = #tpu.dot_dimension_numbers<[1], [0], [0], [1], [0, 0, 1, 1], [], []>} : vector<16x32xbf16>, vector<32x8xbf16>, vector<16x8xf32> -> vector<16x8xf32>
    %103 = vector.extract_strided_slice %102 {offsets = [0, 0], sizes = [16, 4], strides = [1, 1]} : vector<16x8xf32> to vector<16x4xf32>
    %104 = vector.extract_strided_slice %102 {offsets = [0, 4], sizes = [16, 4], strides = [1, 1]} : vector<16x8xf32> to vector<16x4xf32>
    %105 = tpu.transpose %103, [1, 0] : vector<16x4xf32> -> vector<4x16xf32>
    %106 = vector.extract_strided_slice %104 {offsets = [0, 0], sizes = [16, 1], strides = [1, 1]} : vector<16x4xf32> to vector<16x1xf32>
    %107 = vector.extract_strided_slice %105 {offsets = [0, 0], sizes = [1, 16], strides = [1, 1]} : vector<4x16xf32> to vector<1x16xf32>
    %108 = vector.broadcast %106 : vector<16x1xf32> to vector<16x16xf32>
    %109 = vector.broadcast %107 : vector<1x16xf32> to vector<16x16xf32>
    %110 = arith.addf %108, %109 : vector<16x16xf32>
    %111 = vector.extract_strided_slice %104 {offsets = [0, 1], sizes = [16, 1], strides = [1, 1]} : vector<16x4xf32> to vector<16x1xf32>
    %112 = vector.extract_strided_slice %105 {offsets = [1, 0], sizes = [1, 16], strides = [1, 1]} : vector<4x16xf32> to vector<1x16xf32>
    %113 = vector.broadcast %111 : vector<16x1xf32> to vector<16x16xf32>
    %114 = vector.broadcast %112 : vector<1x16xf32> to vector<16x16xf32>
    %115 = arith.addf %113, %114 : vector<16x16xf32>
    %116 = vector.extract_strided_slice %104 {offsets = [0, 2], sizes = [16, 1], strides = [1, 1]} : vector<16x4xf32> to vector<16x1xf32>
    %117 = vector.extract_strided_slice %105 {offsets = [2, 0], sizes = [1, 16], strides = [1, 1]} : vector<4x16xf32> to vector<1x16xf32>
    %118 = vector.broadcast %116 : vector<16x1xf32> to vector<16x16xf32>
    %119 = vector.broadcast %117 : vector<1x16xf32> to vector<16x16xf32>
    %120 = arith.addf %118, %119 : vector<16x16xf32>
    %121 = vector.extract_strided_slice %104 {offsets = [0, 3], sizes = [16, 1], strides = [1, 1]} : vector<16x4xf32> to vector<16x1xf32>
    %122 = vector.extract_strided_slice %105 {offsets = [3, 0], sizes = [1, 16], strides = [1, 1]} : vector<4x16xf32> to vector<1x16xf32>
    %123 = vector.broadcast %121 : vector<16x1xf32> to vector<16x16xf32>
    %124 = vector.broadcast %122 : vector<1x16xf32> to vector<16x16xf32>
    %125 = arith.addf %123, %124 : vector<16x16xf32>
    %126 = tpu.concatenate %110, %115, %120, %125 in 0 : vector<16x16xf32>, vector<16x16xf32>, vector<16x16xf32>, vector<16x16xf32> -> vector<64x16xf32>
    %cst_38 = arith.constant 0.000000e+00 : f32
    %127 = vector.broadcast %cst_38 : f32 to vector<64x16xf32>
    %128 = arith.cmpf oge, %126, %127 : vector<64x16xf32>
    %cst_39 = arith.constant 2.000000e-01 : f32
    %129 = vector.broadcast %cst_39 : f32 to vector<64x16xf32>
    %130 = arith.mulf %129, %126 : vector<64x16xf32>
    %131 = arith.select %128, %126, %130 : vector<64x16xi1>, vector<64x16xf32>
    %c48_40 = arith.constant 48 : index
    %c0_41 = arith.constant 0 : index
    %132 = vector.load %arg2[%c48_40, %c0_41] : memref<192x128xf32, #tpu.memory_space<vmem>>, vector<64x16xf32>
    %cst_42 = arith.constant 0.000000e+00 : f32
    %133 = vector.broadcast %cst_42 : f32 to vector<64x16xf32>
    %134 = arith.cmpf ogt, %132, %133 : vector<64x16xf32>
    %cst_43 = arith.constant -1.000000e+30 : f32
    %135 = vector.broadcast %cst_43 : f32 to vector<64x16xf32>
    %136 = arith.select %134, %131, %135 : vector<64x16xi1>, vector<64x16xf32>
    %cst_44 = arith.constant dense<0xFF800000> : vector<64xf32>
    %137 = vector.multi_reduction <maximumf>, %136, %cst_44 [1] : vector<64x16xf32> to vector<64xf32>
    %138 = vector.shape_cast %137 : vector<64xf32> to vector<64x1xf32>
    %139 = vector.broadcast %138 : vector<64x1xf32> to vector<64x16xf32>
    %140 = arith.subf %136, %139 : vector<64x16xf32>
    %141 = math.exp %140 : vector<64x16xf32>
    %cst_45 = arith.constant dense<0.000000e+00> : vector<64xf32>
    %142 = vector.multi_reduction <add>, %141, %cst_45 [1] : vector<64x16xf32> to vector<64xf32>
    %143 = vector.shape_cast %142 : vector<64xf32> to vector<64x1xf32>
    %144 = tpu.reciprocal %143 {approx = true} : vector<64x1xf32> -> vector<64x1xf32>
    %145 = vector.broadcast %144 : vector<64x1xf32> to vector<64x16xf32>
    %146 = arith.mulf %141, %145 : vector<64x16xf32>
    %147 = arith.truncf %146 : vector<64x16xf32> to vector<64x16xbf16>
    %148 = arith.truncf %99 : vector<16x32xf32> to vector<16x32xbf16>
    %cst_46 = arith.constant dense<0.000000e+00> : vector<64x32xf32>
    %149 = tpu.matmul %147, %148, %cst_46 {dimension_numbers = #tpu.dot_dimension_numbers<[1], [0], [0], [1], [0, 0, 1, 1], [], []>} : vector<64x16xbf16>, vector<16x32xbf16>, vector<64x32xf32> -> vector<64x32xf32>
    %c112_47 = arith.constant 112 : index
    %c0_48 = arith.constant 0 : index
    %150 = vector.load %arg2[%c112_47, %c0_48] : memref<192x128xf32, #tpu.memory_space<vmem>>, vector<4x32xf32>
    %151 = vector.extract_strided_slice %149 {offsets = [0, 0], sizes = [16, 32], strides = [1, 1]} : vector<64x32xf32> to vector<16x32xf32>
    %152 = vector.extract_strided_slice %150 {offsets = [0, 0], sizes = [1, 32], strides = [1, 1]} : vector<4x32xf32> to vector<1x32xf32>
    %153 = vector.broadcast %152 : vector<1x32xf32> to vector<16x32xf32>
    %154 = arith.mulf %151, %153 : vector<16x32xf32>
    %155 = vector.extract_strided_slice %149 {offsets = [16, 0], sizes = [16, 32], strides = [1, 1]} : vector<64x32xf32> to vector<16x32xf32>
    %156 = vector.extract_strided_slice %150 {offsets = [1, 0], sizes = [1, 32], strides = [1, 1]} : vector<4x32xf32> to vector<1x32xf32>
    %157 = vector.broadcast %156 : vector<1x32xf32> to vector<16x32xf32>
    %158 = arith.mulf %155, %157 : vector<16x32xf32>
    %159 = vector.extract_strided_slice %149 {offsets = [32, 0], sizes = [16, 32], strides = [1, 1]} : vector<64x32xf32> to vector<16x32xf32>
    %160 = vector.extract_strided_slice %150 {offsets = [2, 0], sizes = [1, 32], strides = [1, 1]} : vector<4x32xf32> to vector<1x32xf32>
    %161 = vector.broadcast %160 : vector<1x32xf32> to vector<16x32xf32>
    %162 = arith.mulf %159, %161 : vector<16x32xf32>
    %163 = vector.extract_strided_slice %149 {offsets = [48, 0], sizes = [16, 32], strides = [1, 1]} : vector<64x32xf32> to vector<16x32xf32>
    %164 = vector.extract_strided_slice %150 {offsets = [3, 0], sizes = [1, 32], strides = [1, 1]} : vector<4x32xf32> to vector<1x32xf32>
    %165 = vector.broadcast %164 : vector<1x32xf32> to vector<16x32xf32>
    %166 = arith.mulf %163, %165 : vector<16x32xf32>
    %167 = arith.addf %154, %158 : vector<16x32xf32>
    %168 = arith.addf %167, %162 : vector<16x32xf32>
    %169 = arith.addf %168, %166 : vector<16x32xf32>
    %c40 = arith.constant 40 : index
    %c0_49 = arith.constant 0 : index
    %170 = vector.load %arg2[%c40, %c0_49] : memref<192x128xf32, #tpu.memory_space<vmem>>, vector<1x32xf32>
    %171 = vector.broadcast %170 : vector<1x32xf32> to vector<16x32xf32>
    %172 = arith.addf %169, %171 : vector<16x32xf32>
    %c160 = arith.constant 160 : index
    %c0_50 = arith.constant 0 : index
    %173 = vector.load %arg1[%c160, %c0_50] : memref<392x128xbf16, #tpu.memory_space<vmem>>, vector<4x16xbf16>
    %174 = arith.truncf %172 : vector<16x32xf32> to vector<16x32xbf16>
    %cst_51 = arith.constant dense<0.000000e+00> : vector<4x32xf32>
    %175 = tpu.matmul %173, %174, %cst_51 {dimension_numbers = #tpu.dot_dimension_numbers<[1], [0], [0], [1], [0, 0, 1, 1], [], []>} : vector<4x16xbf16>, vector<16x32xbf16>, vector<4x32xf32> -> vector<4x32xf32>
    %176 = vector.extract_strided_slice %175 {offsets = [0, 0], sizes = [2, 32], strides = [1, 1]} : vector<4x32xf32> to vector<2x32xf32>
    %177 = vector.extract_strided_slice %175 {offsets = [2, 0], sizes = [2, 32], strides = [1, 1]} : vector<4x32xf32> to vector<2x32xf32>
    %178 = tpu.concatenate %176, %177 in 1 : vector<2x32xf32>, vector<2x32xf32> -> vector<2x64xf32>
    %c168 = arith.constant 168 : index
    %c0_52 = arith.constant 0 : index
    %179 = vector.load %arg1[%c168, %c0_52] : memref<392x128xbf16, #tpu.memory_space<vmem>>, vector<64x32xbf16>
    %180 = arith.truncf %178 : vector<2x64xf32> to vector<2x64xbf16>
    %cst_53 = arith.constant dense<0.000000e+00> : vector<2x32xf32>
    %181 = tpu.matmul %180, %179, %cst_53 {dimension_numbers = #tpu.dot_dimension_numbers<[1], [0], [0], [1], [0, 0, 1, 1], [], []>} : vector<2x64xbf16>, vector<64x32xbf16>, vector<2x32xf32> -> vector<2x32xf32>
    %c120 = arith.constant 120 : index
    %c0_54 = arith.constant 0 : index
    %182 = vector.load %arg2[%c120, %c0_54] : memref<192x128xf32, #tpu.memory_space<vmem>>, vector<1x32xf32>
    %183 = vector.broadcast %182 : vector<1x32xf32> to vector<2x32xf32>
    %184 = arith.addf %181, %183 : vector<2x32xf32>
    %c128 = arith.constant 128 : index
    %c0_55 = arith.constant 0 : index
    %185 = vector.load %arg2[%c128, %c0_55] : memref<192x128xf32, #tpu.memory_space<vmem>>, vector<1x32xf32>
    %c136 = arith.constant 136 : index
    %c0_56 = arith.constant 0 : index
    %186 = vector.load %arg2[%c136, %c0_56] : memref<192x128xf32, #tpu.memory_space<vmem>>, vector<1x32xf32>
    %cst_57 = arith.constant dense<0.000000e+00> : vector<2xf32>
    %187 = vector.multi_reduction <add>, %184, %cst_57 [1] : vector<2x32xf32> to vector<2xf32>
    %188 = vector.shape_cast %187 : vector<2xf32> to vector<2x1xf32>
    %cst_58 = arith.constant 3.200000e+01 : f32
    %189 = vector.broadcast %cst_58 : f32 to vector<2x1xf32>
    %190 = arith.divf %188, %189 : vector<2x1xf32>
    %191 = vector.broadcast %190 : vector<2x1xf32> to vector<2x32xf32>
    %192 = arith.subf %184, %191 : vector<2x32xf32>
    %193 = arith.mulf %192, %192 : vector<2x32xf32>
    %cst_59 = arith.constant dense<0.000000e+00> : vector<2xf32>
    %194 = vector.multi_reduction <add>, %193, %cst_59 [1] : vector<2x32xf32> to vector<2xf32>
    %195 = vector.shape_cast %194 : vector<2xf32> to vector<2x1xf32>
    %cst_60 = arith.constant 3.200000e+01 : f32
    %196 = vector.broadcast %cst_60 : f32 to vector<2x1xf32>
    %197 = arith.divf %195, %196 : vector<2x1xf32>
    %198 = vector.broadcast %190 : vector<2x1xf32> to vector<2x32xf32>
    %199 = arith.subf %184, %198 : vector<2x32xf32>
    %cst_61 = arith.constant 9.99999974E-6 : f32
    %200 = vector.broadcast %cst_61 : f32 to vector<2x1xf32>
    %201 = arith.addf %197, %200 : vector<2x1xf32>
    %202 = math.rsqrt %201 : vector<2x1xf32>
    %203 = vector.broadcast %202 : vector<2x1xf32> to vector<2x32xf32>
    %204 = arith.mulf %199, %203 : vector<2x32xf32>
    %205 = vector.broadcast %185 : vector<1x32xf32> to vector<2x32xf32>
    %206 = arith.mulf %204, %205 : vector<2x32xf32>
    %207 = vector.broadcast %186 : vector<1x32xf32> to vector<2x32xf32>
    %208 = arith.addf %206, %207 : vector<2x32xf32>
    %209 = arith.mulf %208, %208 : vector<2x32xf32>
    %210 = arith.mulf %208, %209 : vector<2x32xf32>
    %cst_62 = arith.constant 4.471500e-02 : f32
    %211 = vector.broadcast %cst_62 : f32 to vector<2x32xf32>
    %212 = arith.mulf %211, %210 : vector<2x32xf32>
    %213 = arith.addf %208, %212 : vector<2x32xf32>
    %cst_63 = arith.constant 0.797884583 : f32
    %214 = vector.broadcast %cst_63 : f32 to vector<2x32xf32>
    %215 = arith.mulf %214, %213 : vector<2x32xf32>
    %216 = math.tanh %215 : vector<2x32xf32>
    %cst_64 = arith.constant 1.000000e+00 : f32
    %217 = vector.broadcast %cst_64 : f32 to vector<2x32xf32>
    %218 = arith.addf %217, %216 : vector<2x32xf32>
    %cst_65 = arith.constant 5.000000e-01 : f32
    %219 = vector.broadcast %cst_65 : f32 to vector<2x32xf32>
    %220 = arith.mulf %219, %218 : vector<2x32xf32>
    %221 = arith.mulf %208, %220 : vector<2x32xf32>
    %c232 = arith.constant 232 : index
    %c0_66 = arith.constant 0 : index
    %222 = vector.load %arg1[%c232, %c0_66] : memref<392x128xbf16, #tpu.memory_space<vmem>>, vector<32x128xbf16>
    %223 = arith.truncf %221 : vector<2x32xf32> to vector<2x32xbf16>
    %cst_67 = arith.constant dense<0.000000e+00> : vector<2x128xf32>
    %224 = tpu.matmul %223, %222, %cst_67 {dimension_numbers = #tpu.dot_dimension_numbers<[1], [0], [0], [1], [0, 0, 1, 1], [], []>} : vector<2x32xbf16>, vector<32x128xbf16>, vector<2x128xf32> -> vector<2x128xf32>
    %c144_68 = arith.constant 144 : index
    %c0_69 = arith.constant 0 : index
    %225 = vector.load %arg2[%c144_68, %c0_69] : memref<192x128xf32, #tpu.memory_space<vmem>>, vector<1x128xf32>
    %226 = vector.broadcast %225 : vector<1x128xf32> to vector<2x128xf32>
    %227 = arith.addf %224, %226 : vector<2x128xf32>
    %228 = vector.extract_strided_slice %227 {offsets = [0, 0], sizes = [2, 64], strides = [1, 1]} : vector<2x128xf32> to vector<2x64xf32>
    %c152 = arith.constant 152 : index
    %c0_70 = arith.constant 0 : index
    %229 = vector.load %arg2[%c152, %c0_70] : memref<192x128xf32, #tpu.memory_space<vmem>>, vector<1x64xf32>
    %c160_71 = arith.constant 160 : index
    %c0_72 = arith.constant 0 : index
    %230 = vector.load %arg2[%c160_71, %c0_72] : memref<192x128xf32, #tpu.memory_space<vmem>>, vector<1x64xf32>
    %cst_73 = arith.constant dense<0.000000e+00> : vector<2xf32>
    %231 = vector.multi_reduction <add>, %228, %cst_73 [1] : vector<2x64xf32> to vector<2xf32>
    %232 = vector.shape_cast %231 : vector<2xf32> to vector<2x1xf32>
    %cst_74 = arith.constant 6.400000e+01 : f32
    %233 = vector.broadcast %cst_74 : f32 to vector<2x1xf32>
    %234 = arith.divf %232, %233 : vector<2x1xf32>
    %235 = vector.broadcast %234 : vector<2x1xf32> to vector<2x64xf32>
    %236 = arith.subf %228, %235 : vector<2x64xf32>
    %237 = arith.mulf %236, %236 : vector<2x64xf32>
    %cst_75 = arith.constant dense<0.000000e+00> : vector<2xf32>
    %238 = vector.multi_reduction <add>, %237, %cst_75 [1] : vector<2x64xf32> to vector<2xf32>
    %239 = vector.shape_cast %238 : vector<2xf32> to vector<2x1xf32>
    %cst_76 = arith.constant 6.400000e+01 : f32
    %240 = vector.broadcast %cst_76 : f32 to vector<2x1xf32>
    %241 = arith.divf %239, %240 : vector<2x1xf32>
    %242 = vector.broadcast %234 : vector<2x1xf32> to vector<2x64xf32>
    %243 = arith.subf %228, %242 : vector<2x64xf32>
    %cst_77 = arith.constant 9.99999974E-6 : f32
    %244 = vector.broadcast %cst_77 : f32 to vector<2x1xf32>
    %245 = arith.addf %241, %244 : vector<2x1xf32>
    %246 = math.rsqrt %245 : vector<2x1xf32>
    %247 = vector.broadcast %246 : vector<2x1xf32> to vector<2x64xf32>
    %248 = arith.mulf %243, %247 : vector<2x64xf32>
    %249 = vector.broadcast %229 : vector<1x64xf32> to vector<2x64xf32>
    %250 = arith.mulf %248, %249 : vector<2x64xf32>
    %251 = vector.broadcast %230 : vector<1x64xf32> to vector<2x64xf32>
    %252 = arith.addf %250, %251 : vector<2x64xf32>
    %253 = arith.mulf %252, %252 : vector<2x64xf32>
    %254 = arith.mulf %252, %253 : vector<2x64xf32>
    %cst_78 = arith.constant 4.471500e-02 : f32
    %255 = vector.broadcast %cst_78 : f32 to vector<2x64xf32>
    %256 = arith.mulf %255, %254 : vector<2x64xf32>
    %257 = arith.addf %252, %256 : vector<2x64xf32>
    %cst_79 = arith.constant 0.797884583 : f32
    %258 = vector.broadcast %cst_79 : f32 to vector<2x64xf32>
    %259 = arith.mulf %258, %257 : vector<2x64xf32>
    %260 = math.tanh %259 : vector<2x64xf32>
    %cst_80 = arith.constant 1.000000e+00 : f32
    %261 = vector.broadcast %cst_80 : f32 to vector<2x64xf32>
    %262 = arith.addf %261, %260 : vector<2x64xf32>
    %cst_81 = arith.constant 5.000000e-01 : f32
    %263 = vector.broadcast %cst_81 : f32 to vector<2x64xf32>
    %264 = arith.mulf %263, %262 : vector<2x64xf32>
    %265 = arith.mulf %252, %264 : vector<2x64xf32>
    %266 = vector.extract_strided_slice %227 {offsets = [0, 64], sizes = [2, 64], strides = [1, 1]} : vector<2x128xf32> to vector<2x64xf32>
    %c168_82 = arith.constant 168 : index
    %c0_83 = arith.constant 0 : index
    %267 = vector.load %arg2[%c168_82, %c0_83] : memref<192x128xf32, #tpu.memory_space<vmem>>, vector<1x64xf32>
    %c176 = arith.constant 176 : index
    %c0_84 = arith.constant 0 : index
    %268 = vector.load %arg2[%c176, %c0_84] : memref<192x128xf32, #tpu.memory_space<vmem>>, vector<1x64xf32>
    %cst_85 = arith.constant dense<0.000000e+00> : vector<2xf32>
    %269 = vector.multi_reduction <add>, %266, %cst_85 [1] : vector<2x64xf32> to vector<2xf32>
    %270 = vector.shape_cast %269 : vector<2xf32> to vector<2x1xf32>
    %cst_86 = arith.constant 6.400000e+01 : f32
    %271 = vector.broadcast %cst_86 : f32 to vector<2x1xf32>
    %272 = arith.divf %270, %271 : vector<2x1xf32>
    %273 = vector.broadcast %272 : vector<2x1xf32> to vector<2x64xf32>
    %274 = arith.subf %266, %273 : vector<2x64xf32>
    %275 = arith.mulf %274, %274 : vector<2x64xf32>
    %cst_87 = arith.constant dense<0.000000e+00> : vector<2xf32>
    %276 = vector.multi_reduction <add>, %275, %cst_87 [1] : vector<2x64xf32> to vector<2xf32>
    %277 = vector.shape_cast %276 : vector<2xf32> to vector<2x1xf32>
    %cst_88 = arith.constant 6.400000e+01 : f32
    %278 = vector.broadcast %cst_88 : f32 to vector<2x1xf32>
    %279 = arith.divf %277, %278 : vector<2x1xf32>
    %280 = vector.broadcast %272 : vector<2x1xf32> to vector<2x64xf32>
    %281 = arith.subf %266, %280 : vector<2x64xf32>
    %cst_89 = arith.constant 9.99999974E-6 : f32
    %282 = vector.broadcast %cst_89 : f32 to vector<2x1xf32>
    %283 = arith.addf %279, %282 : vector<2x1xf32>
    %284 = math.rsqrt %283 : vector<2x1xf32>
    %285 = vector.broadcast %284 : vector<2x1xf32> to vector<2x64xf32>
    %286 = arith.mulf %281, %285 : vector<2x64xf32>
    %287 = vector.broadcast %267 : vector<1x64xf32> to vector<2x64xf32>
    %288 = arith.mulf %286, %287 : vector<2x64xf32>
    %289 = vector.broadcast %268 : vector<1x64xf32> to vector<2x64xf32>
    %290 = arith.addf %288, %289 : vector<2x64xf32>
    %291 = arith.mulf %290, %290 : vector<2x64xf32>
    %292 = arith.mulf %290, %291 : vector<2x64xf32>
    %cst_90 = arith.constant 4.471500e-02 : f32
    %293 = vector.broadcast %cst_90 : f32 to vector<2x64xf32>
    %294 = arith.mulf %293, %292 : vector<2x64xf32>
    %295 = arith.addf %290, %294 : vector<2x64xf32>
    %cst_91 = arith.constant 0.797884583 : f32
    %296 = vector.broadcast %cst_91 : f32 to vector<2x64xf32>
    %297 = arith.mulf %296, %295 : vector<2x64xf32>
    %298 = math.tanh %297 : vector<2x64xf32>
    %cst_92 = arith.constant 1.000000e+00 : f32
    %299 = vector.broadcast %cst_92 : f32 to vector<2x64xf32>
    %300 = arith.addf %299, %298 : vector<2x64xf32>
    %cst_93 = arith.constant 5.000000e-01 : f32
    %301 = vector.broadcast %cst_93 : f32 to vector<2x64xf32>
    %302 = arith.mulf %301, %300 : vector<2x64xf32>
    %303 = arith.mulf %290, %302 : vector<2x64xf32>
    %304 = tpu.concatenate %265, %303 in 1 : vector<2x64xf32>, vector<2x64xf32> -> vector<2x128xf32>
    %c264 = arith.constant 264 : index
    %c0_94 = arith.constant 0 : index
    %305 = vector.load %arg1[%c264, %c0_94] : memref<392x128xbf16, #tpu.memory_space<vmem>>, vector<128x128xbf16>
    %306 = arith.truncf %304 : vector<2x128xf32> to vector<2x128xbf16>
    %cst_95 = arith.constant dense<0.000000e+00> : vector<2x128xf32>
    %307 = tpu.matmul %306, %305, %cst_95 {dimension_numbers = #tpu.dot_dimension_numbers<[1], [0], [0], [1], [0, 0, 1, 1], [], []>} : vector<2x128xbf16>, vector<128x128xbf16>, vector<2x128xf32> -> vector<2x128xf32>
    %c184 = arith.constant 184 : index
    %c0_96 = arith.constant 0 : index
    %308 = vector.load %arg2[%c184, %c0_96] : memref<192x128xf32, #tpu.memory_space<vmem>>, vector<1x128xf32>
    %309 = vector.broadcast %308 : vector<1x128xf32> to vector<2x128xf32>
    %310 = arith.addf %307, %309 : vector<2x128xf32>
    %c0_97 = arith.constant 0 : index
    %c0_98 = arith.constant 0 : index
    %311 = vector.load %arg3[%c0_97, %c0_98] : memref<2x128xf32, #tpu.memory_space<vmem>>, vector<2x128xf32>
    tpu.vector_store %arg3[%c0_97, %c0_98], %310 {strides = array<i32>} : memref<2x128xf32, #tpu.memory_space<vmem>>, vector<2x128xf32>,
    return
  }
}

</mosaic_0001>

<bundles_post_ra>
// kernel: fwd.1
= control target key start
LH: loop header
LB: loop body
LE: loop exit
PB: predicated region body
PF: predicated region fallthrough
CT: control target
= control target key end

     0   :  { %8 = vsyncpa [#allocation3], 0  ;;  %s1531_s0 = inlined_call_operand.hbm [shape: f32[16,16], index: 0, kind: input, shape index: {}]   ;;  %s1532_s1 = inlined_call_operand.hbm [shape: bf16[392,128], index: 1, kind: input, shape index: {}]   ;;  %s1533_s2 = inlined_call_operand.hbm [shape: f32[192,128], index: 2, kind: input, shape index: {}]   ;;  %s1534_s3 = inlined_call_operand.vmem [shape: f32[2,128], index: 3, kind: output, shape index: {}]  }
   0x1   :  { %9 = vsyncpa [#allocation5], 0  ;;  %s27_s14 = sshll.u32 %s1532_s1, 4  ;;  %s1394_s15 = smov [#allocation4]   ;;  %s28_s14 = int_to_ptr.hbm [resolvable:$true] %s27_s14 }
   0x2   :  { %s29_s16 = sshll.u32 %s1394_s15, 4  ;;  %s14_s19 = sshll.u32 %s1531_s0, 4  ;;  %s30_s16 = int_to_ptr.vmem [resolvable:$true] %s29_s16  ;;  %s15_s19 = int_to_ptr.hbm [resolvable:$true] %s14_s19 }
   0x3   :  { %s1395_s20 = smov 64   ;;  %s1396_s21 = smov 4  }
   0x4   :  { %35 = dma.hbm_to_vmem [thread:$0]  %s28_s14, 3136, %s30_s16, [#allocation5], %s1395_s20, %s1395_s20, %s1396_s21  }
   0x5   :  { %s1397_s22 = smov [#allocation2]   ;;  %s1398_s24 = smov 128  }
   0x6   :  { %s16_s23 = sshll.u32 %s1397_s22, 4  ;;  %s1399_s25 = smov 8   ;;  %s17_s23 = int_to_ptr.vmem [resolvable:$true] %s16_s23 }
   0x7   :  { %22 = dma.hbm_to_vmem [thread:$0]  %s15_s19, 256, %s17_s23, [#allocation3], %s1398_s24, %s1398_s24, %s1399_s25  }
   0x8   :  { %s40_s27 = sshll.u32 %s1533_s2, 4  ;;  %s1400_s28 = smov [#allocation6]   ;;  %s41_s27 = int_to_ptr.hbm [resolvable:$true] %s40_s27 }
   0x9   :  { %s42_s29 = sshll.u32 %s1400_s28, 4  ;;  %s43_s29 = int_to_ptr.vmem [resolvable:$true] %s42_s29 }
   0xa   :  { %48 = dma.hbm_to_vmem [thread:$0]  %s41_s27, 3072, %s43_s29, [#allocation5], %s1398_s24, %s1398_s24, %s1399_s25  }
   0xb   :  { %1390 = dma.done.wait [#allocation3], 256  }
   0xc   :  { %1391 = vsyncadd [#allocation3], 4294967040 }
   0xd   :  { %1392 = dma.done.wait [#allocation5], 6208  }
   0xe   :  { %1393 = vsyncadd [#allocation5], 4294961088  ;;  %v1160_v0 = vld [vmem:[#allocation4] sm:$0xff]  ;;  %v62_v1 = vld [vmem:[#allocation2] sm:$0xff]  ;;  %vm75_vm0 = vcmask 130048   ;;  %vm95_vm1 = vcmask 261120  }
   0xf   :  { %v63_v2 = vld [vmem:[#allocation2 + $0x8] sm:$0xff]  ;;  %86 = vmatpush.bf16.msra.mxu0 %v1160_v0  ;;  %v1239_v4 = vld [vmem:[#allocation6] ss:$0 sm:$0xff]  ;;  %v1401_v11 = vmov 32.0   ;;  %v1163_v31 = vld [vmem:[#allocation4 + $0x10] sm:$0xff]  ;;  %s1402_s0 = smov 96  }
  0x10   :  { %v66_v3 = vpack.c.bf16 %v63_v2, %v62_v1  ;;  %1254 = vrcp.f32 %v1401_v11  ;;  %199 = vmatpush.bf16.msra.mxu1 %v1163_v31  ;;  %v1162_v32 = vld [vmem:[#allocation4 + $0x8] sm:$0xff]  ;;  %v1241_v47 = vld [vmem:[#allocation6 + $0x10] ss:$0 sm:$0xff]  ;;  %s1403_s2 = smov 32   ;;  %vm238_vm9 = vcmask 523264   ;;  %v1165_v31 = vld [vmem:[#allocation4 + $0x20] sm:$0xff] }
  0x11   :  { %v1240_v44 = vld [vmem:[#allocation6 + $0x8] ss:$0 sm:$0xff]  ;;  %300 = vmatpush.bf16.msra.mxu3 %v1165_v31 }
  0x12   :  { %1054 = vmatmul.msk.bf16.vlgmr.msra.gmra.mxu0 %vm75_vm0, %v66_v3 }
  0x14   :  { %200 = vmatpush.bf16.msra.mxu1 %v1162_v32  ;;  %v1164_v32 = vld [vmem:[#allocation4 + $0x18] sm:$0xff] }
  0x15   :  { %301 = vmatpush.bf16.msra.mxu3 %v1164_v32 }
  0x16   :  { %v1255_v12 = vpop.eup %1254 }
  0x17   :  { %v103_v13 = vmul.f32 32.0, %v1255_v12  ;;  %vm107_vm2 = vweird.f32 %v1255_v12 }
  0x19   :  { %v104_v14 = vsub.f32 1.0, %v103_v13 }
  0x1b   :  { %v105_v15 = vmul.f32 %v1255_v12, %v104_v14 }
  0x1d   :  { %v106_v16 = vadd.f32 %v1255_v12, %v105_v15 }
  0x1f   :  { %v1443_v17 = vsel %vm107_vm2, %v1255_v12, %v106_v16 }
  0x8f   :  { %v88_v5 = vpop.f32.mrf.mxu0 }
  0x90   :  { %v89_v6 = vadd.f32 %v1239_v4, %v88_v5 }
  0x92   :  { %v96_v7 = vsel %vm95_vm1, %v89_v6, 0.0 }
  0x93   :  { %97 = vadd.xlane.f32.xlu0 %v96_v7 }
  0x97   :  { %v90_v8 = vpop.f32.mrf.mxu0 }
  0x98   :  { %v91_v9 = vadd.f32 %v1239_v4, %v90_v8 }
  0x9a   :  { %v99_v10 = vsel %vm95_vm1, %v91_v9, 0.0 }
  0x9b   :  { %100 = vadd.xlane.f32.xlu0 %v99_v10 }
 0x106   :  { %v98_v18 = vpop.xlane.xlu0 %97 }
 0x107   :  { %v109_v19 = vmul.f32 %v1443_v17, %v98_v18 }
 0x109   :  { %v111_v20 = vsub.f32 %v89_v6, %v109_v19 }
 0x10b   :  { %v113_v21 = vmul.f32 %v111_v20, %v111_v20 }
 0x10d   :  { %v115_v22 = vsel %vm95_vm1, %v113_v21, 0.0 }
 0x10e   :  { %116 = vadd.xlane.f32.xlu1 %v115_v22  ;;  %v101_v23 = vpop.xlane.xlu0 %100 }
 0x10f   :  { %v110_v24 = vmul.f32 %v1443_v17, %v101_v23 }
 0x111   :  { %v112_v25 = vsub.f32 %v91_v9, %v110_v24 }
 0x113   :  { %v114_v26 = vmul.f32 %v112_v25, %v112_v25 }
 0x115   :  { %v118_v27 = vsel %vm95_vm1, %v114_v26, 0.0 }
 0x116   :  { %119 = vadd.xlane.f32.xlu1 %v118_v27 }
 0x181   :  { %v117_v28 = vpop.xlane.xlu1 %116 }
 0x182   :  { %v121_v29 = vmul.f32 %v117_v28, %v1443_v17 }
 0x184   :  { %v123_v30 = vadd.f32 1e-05, %v121_v29 }
 0x186   :  { %1256 = vrsqrt.f32 %v123_v30  ;;  %vm131_vm4 = vweird.f32 %v123_v30 }
 0x189   :  { %v120_v33 = vpop.xlane.xlu1 %119 }
 0x18a   :  { %v122_v34 = vmul.f32 %v120_v33, %v1443_v17  ;;  %v1242_v33 = vld [vmem:[#allocation6 + $0x18] ss:$0 sm:$0xff] }
 0x18c   :  { %v1257_v35 = vpop.eup %1256  ;;  %v124_v36 = vadd.f32 1e-05, %v122_v34 }
 0x18d   :  { %v126_v37 = vmul.f32 %v1257_v35, %v123_v30  ;;  %vm132_vm3 = vweird.f32 %v1257_v35  ;;  %v1161_v30 = vld [vmem:[#allocation4 + $0x48] sm:$0xff] }
 0x18e   :  { %1258 = vrsqrt.f32 %v124_v36  ;;  %vm133_vm5 = vmor %vm131_vm4, %vm132_vm3  ;;  %vm141_vm7 = vweird.f32 %v124_v36 }
 0x18f   :  { %v127_v38 = vmul.f32 %v1257_v35, %v126_v37 }
 0x191   :  { %v128_v39 = vmul.f32 0.5, %v127_v38 }
 0x193   :  { %v129_v40 = vsub.f32 1.5, %v128_v39 }
 0x194   :  { %v1259_v41 = vpop.eup %1258 }
 0x195   :  { %v130_v42 = vmul.f32 %v1257_v35, %v129_v40  ;;  %v136_v43 = vmul.f32 %v1259_v41, %v124_v36  ;;  %vm142_vm6 = vweird.f32 %v1259_v41 }
 0x196   :  { %vm143_vm8 = vmor %vm141_vm7, %vm142_vm6 }
 0x197   :  { %v134_v45 = vsel %vm133_vm5, %v1257_v35, %v130_v42  ;;  %v137_v46 = vmul.f32 %v1259_v41, %v136_v43 }
 0x198   :  { %v145_v48 = vmul.f32 %v134_v45, %v111_v20 }
 0x199   :  { %v138_v49 = vmul.f32 0.5, %v137_v46 }
 0x19a   :  { %v148_v50 = vmul.f32 %v1240_v44, %v145_v48 }
 0x19b   :  { %v139_v51 = vsub.f32 1.5, %v138_v49 }
 0x19c   :  { %v151_v52 = vadd.f32 %v1241_v47, %v148_v50 }
 0x19d   :  { %v140_v53 = vmul.f32 %v1259_v41, %v139_v51 }
 0x19e   :  { %v153_v54 = vmul.f32 %v151_v52, %v151_v52 }
 0x19f   :  { %v144_v55 = vsel %vm143_vm8, %v1259_v41, %v140_v53 }
 0x1a0   :  { %v146_v56 = vmul.f32 %v144_v55, %v112_v25  ;;  %v155_v57 = vmul.f32 %v153_v54, %v151_v52 }
 0x1a2   :  { %v149_v58 = vmul.f32 %v1240_v44, %v146_v56  ;;  %v157_v59 = vmul.f32 0.044715, %v155_v57 }
 0x1a4   :  { %v152_v60 = vadd.f32 %v1241_v47, %v149_v58  ;;  %v159_v61 = vadd.f32 %v157_v59, %v151_v52 }
 0x1a6   :  { %v154_v62 = vmul.f32 %v152_v60, %v152_v60  ;;  %v161_v63 = vmul.f32 0.7978846, %v159_v61 }
 0x1a8   :  { %v156_v0 = vmul.f32 %v154_v62, %v152_v60  ;;  %1260 = vtanh.f32 %v161_v63 }
 0x1aa   :  { %v158_v1 = vmul.f32 0.044715, %v156_v0 }
 0x1ac   :  { %v160_v2 = vadd.f32 %v158_v1, %v152_v60 }
 0x1ae   :  { %v162_v3 = vmul.f32 0.7978846, %v160_v2  ;;  %v1261_v4 = vpop.eup %1260 }
 0x1af   :  { %v165_v5 = vadd.f32 1.0, %v1261_v4 }
 0x1b0   :  { %1262 = vtanh.f32 %v162_v3 }
 0x1b1   :  { %v167_v8 = vmul.f32 0.5, %v165_v5 }
 0x1b3   :  { %v169_v10 = vmul.f32 %v167_v8, %v151_v52 }
 0x1b6   :  { %v1263_v6 = vpop.eup %1262 }
 0x1b7   :  { %v166_v7 = vadd.f32 1.0, %v1263_v6 }
 0x1b9   :  { %v168_v9 = vmul.f32 0.5, %v166_v7 }
 0x1bb   :  { %v170_v11 = vmul.f32 %v168_v9, %v152_v60  ;;  %v1167_v9 = vld [vmem:[#allocation4 + $0x30] sm:$0xff] }
 0x1bd   :  { %v177_v12 = vpack.c.bf16 %v170_v11, %v169_v10  ;;  %v1243_v10 = vld [vmem:[#allocation6 + $0x20] ss:$0 sm:$0xff]  ;;  %v1166_v11 = vld [vmem:[#allocation4 + $0x28] sm:$0xff] }
 0x1bf   :  { %1063 = vmatmul.msk.bf16.vlgmr.msra.gmra.mxu1 %vm95_vm1, %v177_v12 }
 0x23c   :  { %v202_v13 = vpop.f32.mrf.mxu1 }
 0x244   :  { %v204_v14 = vpop.f32.mrf.mxu1 }
 0x245   :  { %v1210_v15 = vpack.i.bf16 %v204_v14, %v202_v13  ;;  %v227_v29 = vpack.c.bf16 %v204_v14, %v202_v13 }
 0x247   :  { %1211 = vrot.lane.b32.xlu0 %v1210_v15, %s1402_s0  ;;  %1201 = vrot.lane.b32.xlu2 %v1210_v15, %s1403_s2 }
 0x24f   :  { %1206 = vrot.lane.b32.xlu2 %v1210_v15, %s1395_s20 }
 0x2a1   :  { %v1202_v16 = vpop.permute.xlu2 %1201 }
 0x2a2   :  { %v1204_v18 = vunpack.i.h.bf16 %v1202_v16  ;;  %v1203_v19 = vunpack.i.l.bf16 %v1202_v16 }
 0x2a4   :  { %v230_v20 = vpack.c.bf16 %v1204_v18, %v1203_v19 }
 0x2a6   :  { %246 = vmatpush.bf16.msrb.mxu1 %v230_v20 }
 0x2a9   :  { %v1207_v21 = vpop.permute.xlu2 %1206 }
 0x2aa   :  { %v1209_v22 = vunpack.i.h.bf16 %v1207_v21  ;;  %v1208_v23 = vunpack.i.l.bf16 %v1207_v21 }
 0x2ac   :  { %v229_v24 = vpack.c.bf16 %v1209_v22, %v1208_v23 }
 0x2ae   :  { %247 = vmatpush.bf16.msrb.mxu1 %v229_v24 }
 0x2b9   :  { %v1212_v25 = vpop.permute.xlu0 %1211 }
 0x2ba   :  { %v1214_v26 = vunpack.i.h.bf16 %v1212_v25  ;;  %v1213_v27 = vunpack.i.l.bf16 %v1212_v25 }
 0x2bc   :  { %v228_v28 = vpack.c.bf16 %v1214_v26, %v1213_v27 }
 0x2be   :  { %248 = vmatpush.bf16.msrb.mxu1 %v228_v28 }
 0x2c2   :  { %249 = vmatpush.bf16.msrb.mxu1 %v227_v29 }
 0x2c5   :  { %1068 = vmatmul.msk.bf16.vlgmr.msrb.gmra.mxu1 %vm238_vm9, %v1161_v30 }
 0x2c6   :  { %392 = vmatpush.bf16.msra.mxu1 %v1167_v9 }
 0x2ca   :  { %393 = vmatpush.bf16.msra.mxu1 %v1166_v11 }
 0x342   :  { %v251_v34 = vpop.f32.mrf.mxu1 }
 0x343   :  { %v252_v35 = vadd.f32 %v1242_v33, %v251_v34 }
 0x345   :  { %v256_v36 = vmul.f32 %v252_v35, %v252_v35 }
 0x347   :  { %v258_v37 = vmul.f32 %v256_v36, %v252_v35  ;;  %v1169_v36 = vld [vmem:[#allocation4 + $0x40] sm:$0xff] }
 0x349   :  { %v260_v38 = vmul.f32 0.044715, %v258_v37  ;;  %v1168_v37 = vld [vmem:[#allocation4 + $0x38] sm:$0xff] }
 0x34a   :  { %v253_v39 = vpop.f32.mrf.mxu1 }
 0x34b   :  { %v262_v40 = vadd.f32 %v260_v38, %v252_v35  ;;  %v254_v41 = vadd.f32 %v1242_v33, %v253_v39  ;;  %v1404_v38 = vmov 6   ;;  %v1405_v39 = vmov 4  }
 0x34c   :  { %1232 = vset.pattern.permute.xlu1 %v1404_v38  ;;  %1230 = vset.pattern.permute.xlu2 %v1405_v39 }
 0x34d   :  { %v264_v42 = vmul.f32 0.7978846, %v262_v40  ;;  %v257_v43 = vmul.f32 %v254_v41, %v254_v41  ;;  %1233 = vset.pattern.permute.xlu0 %v1405_v39 }
 0x34f   :  { %v259_v44 = vmul.f32 %v257_v43, %v254_v41  ;;  %1264 = vtanh.f32 %v264_v42 }
 0x351   :  { %v261_v45 = vmul.f32 0.044715, %v259_v44 }
 0x353   :  { %v263_v46 = vadd.f32 %v261_v45, %v254_v41  ;;  %v1406_v45 = vmov 5  }
 0x355   :  { %v265_v47 = vmul.f32 0.7978846, %v263_v46  ;;  %v1265_v48 = vpop.eup %1264  ;;  %v1407_v46 = vmov 7  }
 0x356   :  { %v268_v49 = vadd.f32 1.0, %v1265_v48 }
 0x357   :  { %1266 = vtanh.f32 %v265_v47 }
 0x358   :  { %v270_v52 = vmul.f32 0.5, %v268_v49 }
 0x35a   :  { %v272_v54 = vmul.f32 %v270_v52, %v252_v35 }
 0x35d   :  { %v1267_v50 = vpop.eup %1266 }
 0x35e   :  { %v269_v51 = vadd.f32 1.0, %v1267_v50 }
 0x360   :  { %v271_v53 = vmul.f32 0.5, %v269_v51 }
 0x362   :  { %v273_v55 = vmul.f32 %v271_v53, %v254_v41  ;;  %v536_v53 = vld [vmem:[#allocation6 + $0x30] sm:$0xff] }
 0x363   :  { %vm544_vm10 = vcmp.gt.f32.partialorder %v536_v53, 0.0 }
 0x364   :  { %v278_v56 = vpack.c.bf16 %v273_v55, %v272_v54  ;;  %v537_v54 = vld [vmem:[#allocation6 + $0x38] sm:$0xff] }
 0x365   :  { %vm545_vm11 = vcmp.gt.f32.partialorder %v537_v54, 0.0 }
 0x366   :  { %1077 = vmatmul.msk.bf16.vlgmr.msra.gmra.mxu3 %vm95_vm1, %v278_v56 }
 0x3e9   :  { %v303_v57 = vpop.f32.mrf.mxu3 }
 0x3f1   :  { %v305_v58 = vpop.f32.mrf.mxu3 }
 0x3f2   :  { %v1220_v59 = vpack.i.bf16 %v305_v58, %v303_v57  ;;  %v328_v8 = vpack.c.bf16 %v305_v58, %v303_v57 }
 0x3f4   :  { %1221 = vrot.lane.b32.xlu2 %v1220_v59, %s1395_s20  ;;  %1216 = vrot.lane.b32.xlu1 %v1220_v59, %s1403_s2 }
 0x3fc   :  { %1226 = vrot.lane.b32.xlu2 %v1220_v59, %s1402_s0 }
 0x44e   :  { %v1222_v60 = vpop.permute.xlu2 %1221 }
 0x44f   :  { %v1224_v0 = vunpack.i.h.bf16 %v1222_v60  ;;  %v1223_v1 = vunpack.i.l.bf16 %v1222_v60 }
 0x451   :  { %v330_v6 = vpack.c.bf16 %v1224_v0, %v1223_v1 }
 0x456   :  { %v1227_v3 = vpop.permute.xlu2 %1226 }
 0x457   :  { %v1229_v4 = vunpack.i.h.bf16 %v1227_v3  ;;  %v1228_v5 = vunpack.i.l.bf16 %v1227_v3 }
 0x459   :  { %v329_v7 = vpack.c.bf16 %v1229_v4, %v1228_v5 }
 0x466   :  { %v1217_v61 = vpop.permute.xlu1 %1216 }
 0x467   :  { %v1219_v62 = vunpack.i.h.bf16 %v1217_v61  ;;  %v1218_v63 = vunpack.i.l.bf16 %v1217_v61 }
 0x469   :  { %v331_v2 = vpack.c.bf16 %v1219_v62, %v1218_v63 }
 0x46b   :  { %338 = vmatpush.bf16.msrb.mxu3 %v331_v2  ;;  %v538_v2 = vld [vmem:[#allocation6 + $0x40] sm:$0xff] }
 0x46c   :  { %vm546_vm15 = vcmp.gt.f32.partialorder %v538_v2, 0.0 }
 0x46f   :  { %339 = vmatpush.bf16.msrb.mxu3 %v330_v6 }
 0x473   :  { %340 = vmatpush.bf16.msrb.mxu3 %v329_v7 }
 0x477   :  { %341 = vmatpush.bf16.msrb.mxu3 %v328_v8 }
 0x47a   :  { %1078 = vmatmul.msk.bf16.vlgmr.msrb.gmra.mxu3 %vm238_vm9, %v1161_v30 }
 0x47b   :  { %426 = vmatpush.bf16.msra.mxu3 %v1169_v36 }
 0x47f   :  { %427 = vmatpush.bf16.msra.mxu3 %v1168_v37 }
 0x4fd   :  { %v343_v12 = vpop.f32.mrf.mxu3 }
 0x4fe   :  { %v344_v13 = vadd.f32 %v1243_v10, %v343_v12 }
 0x500   :  { %v348_v14 = vmul.f32 %v344_v13, %v344_v13 }
 0x502   :  { %v350_v15 = vmul.f32 %v348_v14, %v344_v13 }
 0x504   :  { %v352_v16 = vmul.f32 0.044715, %v350_v15 }
 0x505   :  { %v345_v18 = vpop.f32.mrf.mxu3 }
 0x506   :  { %v354_v19 = vadd.f32 %v352_v16, %v344_v13  ;;  %v346_v20 = vadd.f32 %v1243_v10, %v345_v18  ;;  %v539_v10 = vld [vmem:[#allocation6 + $0x48] sm:$0xff] }
 0x507   :  { %vm547_vm3 = vcmp.gt.f32.partialorder %v539_v10, 0.0 }
 0x508   :  { %v356_v21 = vmul.f32 0.7978846, %v354_v19  ;;  %v349_v22 = vmul.f32 %v346_v20, %v346_v20 }
 0x50a   :  { %v351_v23 = vmul.f32 %v349_v22, %v346_v20  ;;  %1268 = vtanh.f32 %v356_v21 }
 0x50c   :  { %v353_v24 = vmul.f32 0.044715, %v351_v23 }
 0x50e   :  { %v355_v25 = vadd.f32 %v353_v24, %v346_v20 }
 0x510   :  { %v357_v26 = vmul.f32 0.7978846, %v355_v25  ;;  %v1269_v27 = vpop.eup %1268 }
 0x511   :  { %v360_v28 = vadd.f32 1.0, %v1269_v27  ;;  %v541_v27 = vld [vmem:[#allocation6 + $0x58] sm:$0xff] }
 0x512   :  { %1270 = vtanh.f32 %v357_v26  ;;  %vm549_vm7 = vcmp.gt.f32.partialorder %v541_v27, 0.0 }
 0x513   :  { %v362_v30 = vmul.f32 0.5, %v360_v28 }
 0x515   :  { %v364_v33 = vmul.f32 %v362_v30, %v344_v13 }
 0x518   :  { %v1271_v29 = vpop.eup %1270 }
 0x519   :  { %v361_v31 = vadd.f32 1.0, %v1271_v29 }
 0x51b   :  { %v363_v32 = vmul.f32 0.5, %v361_v31 }
 0x51d   :  { %v365_v34 = vmul.f32 %v363_v32, %v346_v20  ;;  %v542_v20 = vld [vmem:[#allocation6 + $0x60] sm:$0xff] }
 0x51e   :  { %vm550_vm5 = vcmp.gt.f32.partialorder %v542_v20, 0.0 }
 0x51f   :  { %v370_v35 = vpack.c.bf16 %v365_v34, %v364_v33  ;;  %v540_v34 = vld [vmem:[#allocation6 + $0x50] sm:$0xff] }
 0x521   :  { %1087 = vmatmul.msk.bf16.vlgmr.msra.gmra.mxu1 %vm95_vm1, %v370_v35 }
 0x59e   :  { %v395_v40 = vpop.f32.mrf.mxu1 }
 0x5a6   :  { %v397_v41 = vpop.f32.mrf.mxu1 }
 0x5a7   :  { %v404_v42 = vpack.c.bf16 %v397_v41, %v395_v40 }
 0x5a9   :  { %1096 = vmatmul.msk.bf16.vlgmr.msra.gmra.mxu3 %vm95_vm1, %v404_v42  ;;  %671 = vmatpush.bf16.msra.mxu2 %v404_v42 }
 0x62c   :  { %v429_v43 = vpop.f32.mrf.mxu3 }
 0x62d   :  { %491 = vperm.xlu1 %1232, %v429_v43   ;;  %468 = vperm.xlu2 %1230, %v429_v43  }
 0x634   :  { %v431_v44 = vpop.f32.mrf.mxu3 }
 0x635   :  { %1234 = vset.pattern.permute.xlu1 %v1406_v45  ;;  %1231 = vset.pattern.permute.xlu2 %v1406_v45 }
 0x636   :  { %473 = vperm.xlu0 %1233, %v431_v44   ;;  %480 = vperm.xlu2 %1231, %v429_v43  }
 0x637   :  { %484 = vperm.xlu1 %1234, %v431_v44  }
 0x63e   :  { %1236 = vset.pattern.permute.xlu0 %v1404_v38 }
 0x63f   :  { %495 = vperm.xlu0 %1236, %v431_v44   ;;  %1237 = vset.pattern.permute.xlu1 %v1407_v46 }
 0x647   :  { %1238 = vset.pattern.permute.xlu0 %v1407_v46 }
 0x65c   :  { %434 = vxpose.xlu2.b32.start [1/2] (short) (narrow) %v429_v43, 8 }
 0x664   :  { %435 = vxpose.xlu2.b32.end [2/2] (short) (narrow) %v431_v44, 8 }
 0x687   :  { %v469_v47 = vpop.permute.xlu2 %468 }
 0x690   :  { %v481_v48 = vpop.permute.xlu2 %480 }
 0x69f   :  { %v1463_v49 = vpop.permute.xlu1 %491 }
 0x6a8   :  { %v474_v55 = vpop.permute.xlu0 %473 }
 0x6a9   :  { %v485_v5 = vpop.permute.xlu1 %484 }
 0x6b1   :  { %v496_v18 = vpop.permute.xlu0 %495 }
 0x6c6   :  { %1235 = vset.pattern.permute.xlu2 %v1407_v46  ;;  %v543_v46 = vld [vmem:[#allocation6 + $0x68] sm:$0xff] }
 0x6cd   :  { %502 = vperm.xlu2 %1235, %v429_v43  }
 0x6f5   :  { %v1465_v50 = vpop.trf.xlu2 }
 0x6f6   :  { %v476_v51 = vperm.slane %v1465_v50, 0  ;;  %v487_v52 = vperm.slane %v1465_v50, 1  ;;  %v498_v15 = vperm.slane %v1465_v50, 2  ;;  %v509_v16 = vperm.slane %v1465_v50, 3 }
 0x6f8   :  { %v477_v56 = vadd.f32 %v476_v51, %v469_v47  ;;  %v478_v57 = vadd.f32 %v476_v51, %v474_v55  ;;  %v488_v58 = vadd.f32 %v487_v52, %v481_v48  ;;  %v489_v7 = vadd.f32 %v487_v52, %v485_v5 }
 0x6f9   :  { %v500_v22 = vadd.f32 %v498_v15, %v496_v18  ;;  %v499_v31 = vadd.f32 %v498_v15, %v1463_v49 }
 0x6fa   :  { %vm512_vm12 = vcmp.ge.f32.partialorder %v477_v56, 0.0  ;;  %v520_v59 = vmul.f32 0.2, %v477_v56  ;;  %vm513_vm13 = vcmp.ge.f32.partialorder %v478_v57, 0.0  ;;  %v521_v60 = vmul.f32 0.2, %v478_v57 }
 0x6fb   :  { %v522_v63 = vmul.f32 0.2, %v488_v58  ;;  %vm514_vm14 = vcmp.ge.f32.partialorder %v488_v58, 0.0  ;;  %v523_v9 = vmul.f32 0.2, %v489_v7  ;;  %vm515_vm2 = vcmp.ge.f32.partialorder %v489_v7, 0.0 }
 0x6fc   :  { %v528_v61 = vsel %vm512_vm12, %v477_v56, %v520_v59  ;;  %v529_v62 = vsel %vm513_vm13, %v478_v57, %v521_v60  ;;  %v525_v25 = vmul.f32 0.2, %v500_v22  ;;  %vm517_vm6 = vcmp.ge.f32.partialorder %v500_v22, 0.0 }
 0x6fd   :  { %v1469_v0 = vsel %vm544_vm10, %v528_v61, -1e+30  ;;  %v1471_v1 = vsel %vm545_vm11, %v529_v62, -1e+30  ;;  %v530_v6 = vsel %vm514_vm14, %v488_v58, %v522_v63  ;;  %v531_v12 = vsel %vm515_vm2, %v489_v7, %v523_v9 }
 0x6fe   :  { %v560_v3 = vsel %vm75_vm0, %v1469_v0, -inf  ;;  %v563_v4 = vsel %vm75_vm0, %v1471_v1, -inf  ;;  %v1477_v8 = vsel %vm546_vm15, %v530_v6, -1e+30  ;;  %v555_v13 = vsel %vm547_vm3, %v531_v12, -1e+30 }
 0x6ff   :  { %561 = vmax.xlane.f32.xlu1 %v560_v3  ;;  %564 = vmax.xlane.f32.xlu0 %v563_v4  ;;  %v566_v11 = vsel %vm75_vm0, %v1477_v8, -inf  ;;  %v569_v14 = vsel %vm75_vm0, %v555_v13, -inf  ;;  %v533_v29 = vsel %vm517_vm6, %v500_v22, %v525_v25  ;;  %v524_v33 = vmul.f32 0.2, %v499_v31 }
 0x700   :  { %v557_v30 = vsel %vm549_vm7, %v533_v29, -1e+30  ;;  %vm516_vm8 = vcmp.ge.f32.partialorder %v499_v31, 0.0  ;;  %vm548_vm10 = vcmp.gt.f32.partialorder %v540_v34, 0.0  ;;  %vm551_vm12 = vcmp.gt.f32.partialorder %v543_v46, 0.0 }
 0x701   :  { %v575_v32 = vsel %vm75_vm0, %v557_v30, -inf  ;;  %v532_v35 = vsel %vm516_vm8, %v499_v31, %v524_v33  ;;  %vm866_vm2 = vcmask 517120  }
 0x702   :  { %v556_v36 = vsel %vm548_vm10, %v532_v35, -1e+30 }
 0x703   :  { %v572_v37 = vsel %vm75_vm0, %v556_v36, -inf }
 0x707   :  { %567 = vmax.xlane.f32.xlu0 %v566_v11 }
 0x70f   :  { %570 = vmax.xlane.f32.xlu0 %v569_v14 }
 0x718   :  { %506 = vperm.xlu1 %1237, %v431_v44  }
 0x727   :  { %v503_v19 = vpop.permute.xlu2 %502 }
 0x728   :  { %v510_v21 = vadd.f32 %v509_v16, %v503_v19 }
 0x72a   :  { %v526_v23 = vmul.f32 0.2, %v510_v21  ;;  %vm518_vm4 = vcmp.ge.f32.partialorder %v510_v21, 0.0 }
 0x72c   :  { %v534_v24 = vsel %vm518_vm4, %v510_v21, %v526_v23 }
 0x72d   :  { %v1484_v26 = vsel %vm550_vm5, %v534_v24, -1e+30 }
 0x72e   :  { %v578_v28 = vsel %vm75_vm0, %v1484_v26, -inf }
 0x72f   :  { %579 = vmax.xlane.f32.xlu0 %v578_v28 }
 0x737   :  { %576 = vmax.xlane.f32.xlu0 %v575_v32 }
 0x742   :  { %573 = vmax.xlane.f32.xlu1 %v572_v37 }
 0x772   :  { %v565_v38 = vpop.xlane.xlu0 %564  ;;  %v562_v40 = vpop.xlane.xlu1 %561 }
 0x773   :  { %v584_v44 = vsub.f32 %v1469_v0, %v562_v40  ;;  %v585_v53 = vsub.f32 %v1471_v1, %v565_v38 }
 0x775   :  { %v592_v48 = vmul.f32 1.442695, %v584_v44  ;;  %v594_v56 = vmul.f32 1.442695, %v585_v53 }
 0x77a   :  { %v568_v39 = vpop.xlane.xlu0 %567 }
 0x77b   :  { %v586_v58 = vsub.f32 %v1477_v8, %v568_v39 }
 0x77d   :  { %v596_v60 = vmul.f32 1.442695, %v586_v58 }
 0x782   :  { %v571_v41 = vpop.xlane.xlu0 %570 }
 0x783   :  { %v587_v42 = vsub.f32 %v555_v13, %v571_v41 }
 0x785   :  { %v598_v43 = vmul.f32 1.442695, %v587_v42 }
 0x787   :  { %1272 = vpow2.f32 %v598_v43 }
 0x788   :  { %1274 = vpow2.f32 %v592_v48 }
 0x789   :  { %1276 = vpow2.f32 %v594_v56  ;;  %v693_v56 = vld [vmem:[#allocation6 + $0x70] sm:$0xf] }
 0x78a   :  { %v507_v45 = vpop.permute.xlu1 %506  ;;  %1278 = vpow2.f32 %v596_v60  ;;  %v694_v58 = vperm.slane %v693_v56, 0 }
 0x78b   :  { %v511_v47 = vadd.f32 %v509_v16, %v507_v45 }
 0x78d   :  { %v1492_v49 = vpop.eup %1272  ;;  %v527_v50 = vmul.f32 0.2, %v511_v47  ;;  %vm519_vm11 = vcmp.ge.f32.partialorder %v511_v47, 0.0 }
 0x78e   :  { %v617_v51 = vsel %vm75_vm0, %v1492_v49, 0.0  ;;  %v1275_v57 = vpop.eup %1274 }
 0x78f   :  { %618 = vadd.xlane.f32.xlu1 %v617_v51  ;;  %v535_v52 = vsel %vm519_vm11, %v511_v47, %v527_v50  ;;  %v608_v59 = vsel %vm75_vm0, %v1275_v57, 0.0  ;;  %v1277_v61 = vpop.eup %1276 }
 0x790   :  { %v559_v54 = vsel %vm551_vm12, %v535_v52, -1e+30  ;;  %v611_v62 = vsel %vm75_vm0, %v1277_v61, 0.0  ;;  %v1279_v0 = vpop.eup %1278 }
 0x791   :  { %v581_v55 = vsel %vm75_vm0, %v559_v54, -inf  ;;  %v614_v1 = vsel %vm75_vm0, %v1279_v0, 0.0 }
 0x792   :  { %582 = vmax.xlane.f32.xlu0 %v581_v55 }
 0x79a   :  { %609 = vadd.xlane.f32.xlu0 %v608_v59  ;;  %v700_v59 = vperm.slane %v693_v56, 2 }
 0x7a2   :  { %612 = vadd.xlane.f32.xlu0 %v611_v62  ;;  %v580_v63 = vpop.xlane.xlu0 %579  ;;  %v703_v62 = vperm.slane %v693_v56, 3 }
 0x7a3   :  { %v590_v9 = vsub.f32 %v1484_v26, %v580_v63 }
 0x7a5   :  { %v604_v11 = vmul.f32 1.442695, %v590_v9 }
 0x7aa   :  { %615 = vadd.xlane.f32.xlu0 %v614_v1  ;;  %v577_v2 = vpop.xlane.xlu0 %576 }
 0x7ab   :  { %v589_v3 = vsub.f32 %v557_v30, %v577_v2 }
 0x7ad   :  { %v602_v4 = vmul.f32 1.442695, %v589_v3 }
 0x7af   :  { %1280 = vpow2.f32 %v602_v4 }
 0x7b5   :  { %v1281_v5 = vpop.eup %1280  ;;  %v574_v6 = vpop.xlane.xlu1 %573 }
 0x7b6   :  { %v588_v7 = vsub.f32 %v556_v36, %v574_v6  ;;  %v623_v8 = vsel %vm75_vm0, %v1281_v5, 0.0 }
 0x7b7   :  { %624 = vadd.xlane.f32.xlu1 %v623_v8 }
 0x7b8   :  { %v600_v10 = vmul.f32 1.442695, %v588_v7 }
 0x7ba   :  { %1282 = vpow2.f32 %v600_v10 }
 0x7bb   :  { %1284 = vpow2.f32 %v604_v11 }
 0x7c0   :  { %v1283_v12 = vpop.eup %1282 }
 0x7c1   :  { %v620_v13 = vsel %vm75_vm0, %v1283_v12, 0.0  ;;  %v1285_v14 = vpop.eup %1284 }
 0x7c2   :  { %621 = vadd.xlane.f32.xlu0 %v620_v13  ;;  %v626_v15 = vsel %vm75_vm0, %v1285_v14, 0.0 }
 0x7ca   :  { %627 = vadd.xlane.f32.xlu0 %v626_v15 }
 0x802   :  { %v619_v30 = vpop.xlane.xlu1 %618 }
 0x805   :  { %v583_v16 = vpop.xlane.xlu0 %582 }
 0x806   :  { %v591_v18 = vsub.f32 %v559_v54, %v583_v16 }
 0x808   :  { %v606_v19 = vmul.f32 1.442695, %v591_v18  ;;  %v716_v18 = vld [vmem:[#allocation4 + $0x50] sm:$0x3] }
 0x80a   :  { %1286 = vpow2.f32 %v606_v19  ;;  %v1173_v19 = vld [vmem:[#allocation4 + $0x6c] sm:$0xff] }
 0x80b   :  { %782 = vmatpush.bf16.msrb.mxu1 %v1173_v19 }
 0x80d   :  { %v610_v20 = vpop.xlane.xlu0 %609 }
 0x80e   :  { %1288 = vrcp.f32 %v610_v20  ;;  %v1172_v20 = vld [vmem:[#allocation4 + $0x64] sm:$0xff] }
 0x80f   :  { %783 = vmatpush.bf16.msrb.mxu1 %v1172_v20 }
 0x810   :  { %v1287_v21 = vpop.eup %1286 }
 0x811   :  { %v629_v22 = vsel %vm75_vm0, %v1287_v21, 0.0 }
 0x812   :  { %630 = vadd.xlane.f32.xlu1 %v629_v22 }
 0x814   :  { %v1289_v24 = vpop.eup %1288 }
 0x815   :  { %v613_v23 = vpop.xlane.xlu0 %612  ;;  %v640_v26 = vmul.f32 %v1289_v24, %v1275_v57  ;;  %v697_v57 = vperm.slane %v693_v56, 1 }
 0x816   :  { %1290 = vrcp.f32 %v613_v23 }
 0x81c   :  { %v1291_v25 = vpop.eup %1290 }
 0x81d   :  { %v641_v27 = vmul.f32 %v1291_v25, %v1277_v61  ;;  %v616_v28 = vpop.xlane.xlu0 %615  ;;  %v1170_v25 = vld [vmem:[#allocation4 + $0x54] sm:$0xff] }
 0x81e   :  { %1292 = vrcp.f32 %v616_v28 }
 0x81f   :  { %v648_v29 = vpack.c.bf16 %v641_v27, %v640_v26  ;;  %1294 = vrcp.f32 %v619_v30 }
 0x821   :  { %1097 = vmatmul.msk.bf16.vlgmr.msra.gmra.mxu2 %vm75_vm0, %v648_v29  ;;  %v1245_v29 = vld [vmem:[#allocation6 + $0x78] ss:$0 sm:$0xff] }
 0x824   :  { %v1293_v31 = vpop.eup %1292 }
 0x825   :  { %v1295_v32 = vpop.eup %1294  ;;  %v642_v33 = vmul.f32 %v1293_v31, %v1279_v0 }
 0x826   :  { %v643_v34 = vmul.f32 %v1295_v32, %v1492_v49 }
 0x828   :  { %v649_v35 = vpack.c.bf16 %v643_v34, %v642_v33 }
 0x82a   :  { %v625_v36 = vpop.xlane.xlu1 %624 }
 0x82b   :  { %1296 = vrcp.f32 %v625_v36 }
 0x831   :  { %1098 = vmatmul.msk.bf16.gmra.mxu2 %vm75_vm0, %v649_v35  ;;  %v1297_v38 = vpop.eup %1296 }
 0x832   :  { %v645_v41 = vmul.f32 %v1297_v38, %v1281_v5 }
 0x835   :  { %v622_v37 = vpop.xlane.xlu0 %621 }
 0x836   :  { %1298 = vrcp.f32 %v622_v37 }
 0x83c   :  { %v1299_v39 = vpop.eup %1298 }
 0x83d   :  { %v644_v40 = vmul.f32 %v1299_v39, %v1283_v12  ;;  %v628_v43 = vpop.xlane.xlu0 %627  ;;  %v1244_v12 = vld [vmem:[#allocation6 + $0x28] ss:$0 sm:$0xff]  ;;  %v1175_v39 = vld [vmem:[#allocation4 + $0x7c] sm:$0xff] }
 0x83e   :  { %1300 = vrcp.f32 %v628_v43  ;;  %857 = vmatpush.bf16.msrb.mxu3 %v1175_v39 }
 0x83f   :  { %v650_v42 = vpack.c.bf16 %v645_v41, %v644_v40  ;;  %v1174_v40 = vld [vmem:[#allocation4 + $0x74] sm:$0xff] }
 0x841   :  { %1099 = vmatmul.msk.bf16.gmra.mxu2 %vm75_vm0, %v650_v42 }
 0x842   :  { %858 = vmatpush.bf16.msrb.mxu3 %v1174_v40 }
 0x844   :  { %v1301_v45 = vpop.eup %1300 }
 0x845   :  { %v646_v47 = vmul.f32 %v1301_v45, %v1285_v14 }
 0x885   :  { %v631_v44 = vpop.xlane.xlu1 %630 }
 0x886   :  { %1302 = vrcp.f32 %v631_v44 }
 0x88c   :  { %v1303_v46 = vpop.eup %1302 }
 0x88d   :  { %v647_v48 = vmul.f32 %v1303_v46, %v1287_v21  ;;  %v1171_v21 = vld [vmem:[#allocation4 + $0x5c] sm:$0xff] }
 0x88e   :  { %784 = vmatpush.bf16.msrb.mxu1 %v1171_v21 }
 0x88f   :  { %v651_v49 = vpack.c.bf16 %v647_v48, %v646_v47 }
 0x891   :  { %1100 = vmatmul.msk.bf16.gmra.mxu2 %vm75_vm0, %v651_v49 }
 0x892   :  { %785 = vmatpush.bf16.msrb.mxu1 %v1170_v25  ;;  %v1251_v25 = vld [vmem:[#allocation6 + $0xa8] ss:$0 sm:$0xff] }
 0x8a4   :  { %v673_v50 = vpop.f32.mrf.mxu2 }
 0x8a5   :  { %v695_v63 = vmul.f32 %v694_v58, %v673_v50  ;;  %v1246_v50 = vld [vmem:[#allocation6 + $0x80] ss:$0 sm:$0xff] }
 0x8ac   :  { %v675_v51 = vpop.f32.mrf.mxu2 }
 0x8ad   :  { %v696_v2 = vmul.f32 %v694_v58, %v675_v51 }
 0x8b4   :  { %v678_v52 = vpop.f32.mrf.mxu2 }
 0x8b5   :  { %v698_v61 = vmul.f32 %v697_v57, %v678_v52  ;;  %v1247_v52 = vld [vmem:[#allocation6 + $0x88] ss:$0 sm:$0xff] }
 0x8b7   :  { %v706_v3 = vadd.f32 %v698_v61, %v695_v63 }
 0x8bc   :  { %v680_v53 = vpop.f32.mrf.mxu2 }
 0x8bd   :  { %v699_v0 = vmul.f32 %v697_v57, %v680_v53 }
 0x8bf   :  { %v707_v6 = vadd.f32 %v699_v0, %v696_v2 }
 0x8c4   :  { %v683_v54 = vpop.f32.mrf.mxu2 }
 0x8c5   :  { %v701_v1 = vmul.f32 %v700_v59, %v683_v54 }
 0x8c7   :  { %v708_v7 = vadd.f32 %v706_v3, %v701_v1  ;;  %v1248_v1 = vld [vmem:[#allocation6 + $0x90] ss:$0 sm:$0xff] }
 0x8cc   :  { %v685_v55 = vpop.f32.mrf.mxu2 }
 0x8cd   :  { %v702_v4 = vmul.f32 %v700_v59, %v685_v55 }
 0x8cf   :  { %v709_v9 = vadd.f32 %v707_v6, %v702_v4 }
 0x914   :  { %v688_v60 = vpop.f32.mrf.mxu2 }
 0x915   :  { %v704_v5 = vmul.f32 %v703_v62, %v688_v60 }
 0x917   :  { %v710_v10 = vadd.f32 %v708_v7, %v704_v5 }
 0x919   :  { %v714_v14 = vadd.f32 %v1244_v12, %v710_v10 }
 0x91c   :  { %v690_v8 = vpop.f32.mrf.mxu2 }
 0x91d   :  { %v705_v11 = vmul.f32 %v703_v62, %v690_v8  ;;  %v1408_v8 = vmov 64.0  }
 0x91f   :  { %v711_v13 = vadd.f32 %v709_v9, %v705_v11 }
 0x921   :  { %v715_v15 = vadd.f32 %v1244_v12, %v711_v13 }
 0x923   :  { %v717_v16 = vpack.c.bf16 %v715_v15, %v714_v14 }
 0x925   :  { %728 = vmatpush.bf16.msrb.mxu0 %v717_v16 }
 0x928   :  { %1101 = vmatmul.msk.bf16.vlgmr.msrb.gmra.mxu0 %vm75_vm0, %v716_v18  ;;  %vm793_vm0 = vcmask 254976  }
 0x9a5   :  { %v730_v22 = vpop.f32.mrf.mxu0 }
 0x9a6   :  { %v735_v23 = vrot.slane %v730_v22, 2 }
 0x9a8   :  { %736 = vrot.lane.b32.xlu0 %v735_v23, %s1403_s2 }
 0x9ad   :  { %v732_v24 = vpop.f32.mrf.mxu0 }
 0xa1a   :  { %v737_v26 = vpop.permute.xlu0 %736 }
 0xa1b   :  { %v739_v27 = vsel %vm95_vm1, %v730_v22, %v737_v26  ;;  %v1252_v26 = vld [vmem:[#allocation6 + $0xb0] ss:$0 sm:$0xff] }
 0xa1c   :  { %v748_v28 = vpack.c.bf16 %v739_v27, %v739_v27 }
 0xa1e   :  { %1118 = vmatmul.msk.bf16.vlgmr.msrb.gmra.mxu1 %vm238_vm9, %v748_v28 }
 0xa9b   :  { %v787_v30 = vpop.f32.mrf.mxu1 }
 0xa9c   :  { %v788_v31 = vadd.f32 %v1245_v29, %v787_v30 }
 0xa9e   :  { %v794_v32 = vsel %vm793_vm0, %v788_v31, 0.0 }
 0xa9f   :  { %795 = vadd.xlane.f32.xlu1 %v794_v32 }
 0xaa3   :  { %v789_v33 = vpop.f32.mrf.mxu1 }
 0xb12   :  { %v796_v34 = vpop.xlane.xlu1 %795 }
 0xb13   :  { %v797_v35 = vmul.f32 %v796_v34, %v1443_v17 }
 0xb15   :  { %v798_v36 = vsub.f32 %v788_v31, %v797_v35 }
 0xb17   :  { %v799_v37 = vmul.f32 %v798_v36, %v798_v36 }
 0xb19   :  { %v800_v38 = vsel %vm793_vm0, %v799_v37, 0.0  ;;  %v1183_v37 = vld [vmem:[#allocation4 + $0xbc] sm:$0xff] }
 0xb1a   :  { %801 = vadd.xlane.f32.xlu1 %v800_v38  ;;  %1030 = vmatpush.bf16.msra.mxu0 %v1183_v37 }
 0xb8d   :  { %v802_v41 = vpop.xlane.xlu1 %801 }
 0xb8e   :  { %v803_v42 = vmul.f32 %v802_v41, %v1443_v17  ;;  %v1182_v41 = vld [vmem:[#allocation4 + $0xb4] sm:$0xff] }
 0xb8f   :  { %1031 = vmatpush.bf16.msra.mxu0 %v1182_v41 }
 0xb90   :  { %v804_v43 = vadd.f32 1e-05, %v803_v42  ;;  %v1249_v42 = vld [vmem:[#allocation6 + $0x98] ss:$0 sm:$0xff] }
 0xb92   :  { %1304 = vrsqrt.f32 %v804_v43  ;;  %vm811_vm14 = vweird.f32 %v804_v43 }
 0xb98   :  { %v1305_v44 = vpop.eup %1304 }
 0xb99   :  { %v806_v45 = vmul.f32 %v1305_v44, %v804_v43  ;;  %vm812_vm13 = vweird.f32 %v1305_v44 }
 0xb9a   :  { %vm813_vm15 = vmor %vm811_vm14, %vm812_vm13 }
 0xb9b   :  { %v807_v46 = vmul.f32 %v1305_v44, %v806_v45 }
 0xb9d   :  { %v808_v47 = vmul.f32 0.5, %v807_v46  ;;  %v1181_v46 = vld [vmem:[#allocation4 + $0xac] sm:$0xff] }
 0xb9e   :  { %1032 = vmatpush.bf16.msra.mxu0 %v1181_v46 }
 0xb9f   :  { %v809_v48 = vsub.f32 1.5, %v808_v47  ;;  %v1250_v47 = vld [vmem:[#allocation6 + $0xa0] ss:$0 sm:$0xff] }
 0xba1   :  { %v810_v49 = vmul.f32 %v1305_v44, %v809_v48 }
 0xba3   :  { %v814_v51 = vsel %vm813_vm15, %v1305_v44, %v810_v49  ;;  %v1180_v49 = vld [vmem:[#allocation4 + $0xa4] sm:$0xff] }
 0xba4   :  { %v815_v53 = vmul.f32 %v814_v51, %v798_v36  ;;  %1033 = vmatpush.bf16.msra.mxu0 %v1180_v49 }
 0xba6   :  { %v817_v54 = vmul.f32 %v1246_v50, %v815_v53  ;;  %v1179_v53 = vld [vmem:[#allocation4 + $0x9c] sm:$0xff] }
 0xba8   :  { %v819_v55 = vadd.f32 %v1247_v52, %v817_v54  ;;  %1034 = vmatpush.bf16.msra.mxu0 %v1179_v53 }
 0xbaa   :  { %v820_v56 = vmul.f32 %v819_v55, %v819_v55 }
 0xbac   :  { %v821_v17 = vmul.f32 %v820_v56, %v819_v55 }
 0xbae   :  { %v822_v57 = vmul.f32 0.044715, %v821_v17 }
 0xbb0   :  { %v823_v58 = vadd.f32 %v822_v57, %v819_v55  ;;  %v1178_v57 = vld [vmem:[#allocation4 + $0x94] sm:$0xff] }
 0xbb1   :  { %1035 = vmatpush.bf16.msra.mxu0 %v1178_v57 }
 0xbb2   :  { %v824_v59 = vmul.f32 0.7978846, %v823_v58 }
 0xbb4   :  { %1306 = vtanh.f32 %v824_v59 }
 0xbb5   :  { %1308 = vrcp.f32 %v1408_v8 }
 0xbba   :  { %v1307_v60 = vpop.eup %1306 }
 0xbbb   :  { %v826_v61 = vadd.f32 1.0, %v1307_v60  ;;  %v1309_v9 = vpop.eup %1308  ;;  %v1177_v60 = vld [vmem:[#allocation4 + $0x8c] sm:$0xff] }
 0xbbc   :  { %v871_v10 = vmul.f32 64.0, %v1309_v9  ;;  %1036 = vmatpush.bf16.msra.mxu0 %v1177_v60 }
 0xbbd   :  { %v827_v62 = vmul.f32 0.5, %v826_v61 }
 0xbbe   :  { %v872_v11 = vsub.f32 1.0, %v871_v10 }
 0xbbf   :  { %v828_v63 = vmul.f32 %v827_v62, %v819_v55 }
 0xbc0   :  { %v873_v12 = vmul.f32 %v1309_v9, %v872_v11 }
 0xbc1   :  { %v833_v0 = vpack.c.bf16 %v828_v63, %v828_v63 }
 0xbc2   :  { %v874_v13 = vadd.f32 %v1309_v9, %v873_v12 }
 0xbc3   :  { %1127 = vmatmul.msk.bf16.vlgmr.msrb.gmra.mxu3 %vm95_vm1, %v833_v0  ;;  %vm875_vm1 = vweird.f32 %v1309_v9  ;;  %v1176_v0 = vld [vmem:[#allocation4 + $0x84] sm:$0xff] }
 0xbc4   :  { %v876_v14 = vsel %vm875_vm1, %v1309_v9, %v874_v13  ;;  %1037 = vmatpush.bf16.msra.mxu0 %v1176_v0 }
 0xc46   :  { %v860_v2 = vpop.f32.mrf.mxu3 }
 0xc47   :  { %v861_v3 = vadd.f32 %v1248_v1, %v860_v2 }
 0xc49   :  { %912 = vrot.lane.b32.xlu2 %v861_v3, %s1395_s20  ;;  %v867_v5 = vsel %vm866_vm2, %v861_v3, 0.0 }
 0xc4e   :  { %v862_v4 = vpop.f32.mrf.mxu3 }
 0xc72   :  { %868 = vadd.xlane.f32.xlu2 %v867_v5 }
 0xca3   :  { %v913_v6 = vpop.permute.xlu2 %912 }
 0xca4   :  { %v915_v7 = vsel %vm866_vm2, %v913_v6, 0.0 }
 0xca5   :  { %916 = vadd.xlane.f32.xlu1 %v915_v7 }
 0xce5   :  { %v869_v15 = vpop.xlane.xlu2 %868 }
 0xce6   :  { %v877_v16 = vmul.f32 %v876_v14, %v869_v15 }
 0xce8   :  { %v878_v18 = vsub.f32 %v861_v3, %v877_v16 }
 0xcea   :  { %v879_v19 = vmul.f32 %v878_v18, %v878_v18 }
 0xcec   :  { %v880_v20 = vsel %vm866_vm2, %v879_v19, 0.0 }
 0xced   :  { %881 = vadd.xlane.f32.xlu1 %v880_v20 }
 0xd06   :  { %943 = vrot.lane.b32.xlu1 %v1251_v25, %s1395_s20 }
 0xd0e   :  { %949 = vrot.lane.b32.xlu1 %v1252_v26, %s1395_s20 }
 0xd18   :  { %v917_v21 = vpop.xlane.xlu1 %916 }
 0xd19   :  { %v918_v22 = vmul.f32 %v917_v21, %v876_v14 }
 0xd1b   :  { %v919_v23 = vsub.f32 %v861_v3, %v918_v22 }
 0xd1d   :  { %v920_v24 = vmul.f32 %v919_v23, %v919_v23 }
 0xd1f   :  { %922 = vrot.lane.b32.xlu0 %v920_v24, %s1395_s20 }
 0xd60   :  { %v882_v29 = vpop.xlane.xlu1 %881 }
 0xd61   :  { %v883_v30 = vmul.f32 %v882_v29, %v876_v14 }
 0xd63   :  { %v884_v31 = vadd.f32 1e-05, %v883_v30 }
 0xd65   :  { %1310 = vrsqrt.f32 %v884_v31  ;;  %vm891_vm4 = vweird.f32 %v884_v31 }
 0xd6b   :  { %v1311_v32 = vpop.eup %1310 }
 0xd6c   :  { %v886_v33 = vmul.f32 %v1311_v32, %v884_v31  ;;  %vm892_vm3 = vweird.f32 %v1311_v32 }
 0xd6d   :  { %vm893_vm5 = vmor %vm891_vm4, %vm892_vm3 }
 0xd6e   :  { %v887_v34 = vmul.f32 %v1311_v32, %v886_v33 }
 0xd70   :  { %v888_v35 = vmul.f32 0.5, %v887_v34 }
 0xd72   :  { %v889_v36 = vsub.f32 1.5, %v888_v35 }
 0xd74   :  { %v890_v38 = vmul.f32 %v1311_v32, %v889_v36 }
 0xd76   :  { %v894_v39 = vsel %vm893_vm5, %v1311_v32, %v890_v38 }
 0xd77   :  { %v895_v43 = vmul.f32 %v894_v39, %v878_v18 }
 0xd78   :  { %v944_v56 = vpop.permute.xlu1 %943 }
 0xd79   :  { %v897_v48 = vmul.f32 %v1249_v42, %v895_v43 }
 0xd7b   :  { %v899_v50 = vadd.f32 %v1250_v47, %v897_v48 }
 0xd7d   :  { %v900_v54 = vmul.f32 %v899_v50, %v899_v50 }
 0xd7f   :  { %v901_v58 = vmul.f32 %v900_v54, %v899_v50 }
 0xd80   :  { %v950_v2 = vpop.permute.xlu1 %949 }
 0xd81   :  { %v902_v62 = vmul.f32 0.044715, %v901_v58 }
 0xd83   :  { %v903_v4 = vadd.f32 %v902_v62, %v899_v50 }
 0xd85   :  { %v904_v7 = vmul.f32 0.7978846, %v903_v4 }
 0xd91   :  { %v923_v27 = vpop.permute.xlu0 %922 }
 0xd92   :  { %v925_v28 = vsel %vm866_vm2, %v923_v27, 0.0 }
 0xd93   :  { %926 = vadd.xlane.f32.xlu0 %v925_v28 }
 0xe06   :  { %v927_v40 = vpop.xlane.xlu0 %926 }
 0xe07   :  { %v928_v44 = vmul.f32 %v927_v40, %v876_v14 }
 0xe09   :  { %v929_v45 = vadd.f32 1e-05, %v928_v44 }
 0xe0b   :  { %1312 = vrsqrt.f32 %v929_v45  ;;  %vm936_vm7 = vweird.f32 %v929_v45 }
 0xe0c   :  { %1314 = vtanh.f32 %v904_v7 }
 0xe11   :  { %v1313_v51 = vpop.eup %1312 }
 0xe12   :  { %v931_v52 = vmul.f32 %v1313_v51, %v929_v45  ;;  %vm937_vm6 = vweird.f32 %v1313_v51  ;;  %v1315_v12 = vpop.eup %1314 }
 0xe13   :  { %vm938_vm8 = vmor %vm936_vm7, %vm937_vm6  ;;  %v906_v13 = vadd.f32 1.0, %v1315_v12 }
 0xe14   :  { %v932_v55 = vmul.f32 %v1313_v51, %v931_v52 }
 0xe15   :  { %v907_v16 = vmul.f32 0.5, %v906_v13 }
 0xe16   :  { %v933_v17 = vmul.f32 0.5, %v932_v55 }
 0xe17   :  { %v908_v20 = vmul.f32 %v907_v16, %v899_v50 }
 0xe18   :  { %v934_v59 = vsub.f32 1.5, %v933_v17 }
 0xe1a   :  { %v935_v61 = vmul.f32 %v1313_v51, %v934_v59 }
 0xe1c   :  { %v939_v63 = vsel %vm938_vm8, %v1313_v51, %v935_v61 }
 0xe1d   :  { %v940_v1 = vmul.f32 %v939_v63, %v919_v23  ;;  %v1253_v23 = vld [vmem:[#allocation6 + $0xb8] ss:$0 sm:$0xff] }
 0xe1f   :  { %v946_v3 = vmul.f32 %v944_v56, %v940_v1 }
 0xe21   :  { %v952_v5 = vadd.f32 %v950_v2, %v946_v3 }
 0xe23   :  { %v953_v6 = vmul.f32 %v952_v5, %v952_v5 }
 0xe25   :  { %v954_v8 = vmul.f32 %v953_v6, %v952_v5 }
 0xe27   :  { %v955_v9 = vmul.f32 0.044715, %v954_v8 }
 0xe29   :  { %v956_v10 = vadd.f32 %v955_v9, %v952_v5 }
 0xe2b   :  { %v957_v11 = vmul.f32 0.7978846, %v956_v10 }
 0xe2d   :  { %1316 = vtanh.f32 %v957_v11 }
 0xe33   :  { %v1317_v14 = vpop.eup %1316 }
 0xe34   :  { %v959_v15 = vadd.f32 1.0, %v1317_v14 }
 0xe36   :  { %v960_v18 = vmul.f32 0.5, %v959_v15 }
 0xe38   :  { %v961_v19 = vmul.f32 %v960_v18, %v952_v5 }
 0xe3a   :  { %v962_v21 = vsel %vm238_vm9, %v908_v20, %v961_v19 }
 0xe3b   :  { %v979_v22 = vpack.c.bf16 %v962_v21, %v962_v21 }
 0xe3d   :  { %1038 = vmatmul.bf16.vlgmr.msra.gmra.mxu0 %v979_v22 }
 0xeba   :  { %v1039_v24 = vpop.f32.mrf.mxu0 }
 0xebb   :  { %v1040_v25 = vadd.f32 %v1253_v23, %v1039_v24 }
 0xebd   :  { %1043 = vst [vmem:[%s1534_s3] sm:$0x3] %v1040_v25 }
 0xec2   :  { %v1041_v26 = vpop.f32.mrf.mxu0 }
 0xec3   :  { %1048 = vsyncpa [#allocation3], 1 }
 0xec4   :  { %1049 = vsyncpa [#allocation5], 1 }

</bundles_post_ra>
